<compile_context>
chip_gen: v7x
topology: tpu7x:2x2x1
jax: 0.10.0
libtpu: 0.0.40
codegen_flags: <defaults>
</compile_context>

<pallas_src>
import functools

import jax
import jax.numpy as jnp
from jax.experimental import pallas as pl
from jax.experimental.pallas import tpu as pltpu


def _round_up(x, m):
    return ((x + m - 1) // m) * m


def _pick_block_b(batch, seq):
    """Batch elements per grid step: fill the MXU M-dim (aim for ~256 flattened
    rows) while keeping block_b a divisor of batch.
    TODO(synk): on v7x prefer an even number of resulting grid steps so both
    TensorCores stay busy when the batch is large."""
    target = max(1, -(-256 // max(seq, 1)))      # ceil(256 / seq)
    best = 1
    for cand in range(1, batch + 1):
        if batch % cand == 0 and cand <= target:
            best = cand
    return best


# ----------------------------------------------------------------------------
# Fused forward kernel: one grid step == block_b batch elements
# ----------------------------------------------------------------------------
def _merhan_kernel(audio_ref, text_ref,
                   w_in_ref, b_in_ref, w_hid_ref, b_hid_ref,
                   w_cls1_ref, b_cls1_ref,
                   logits_ref, attn_ref,
                   *, seg, hp, block_b, seq, slot):
    bs = block_b * seq

    def dense(x, w, b, relu=False):
        # bf16 operands on the MXU, f32 accumulation; bias/ReLU stay f32 (VPU).
        y = jnp.dot(x.astype(w.dtype), w, preferred_element_type=jnp.float32) + b
        return jnp.maximum(y, 0.0) if relu else y

    def seg_dense(x, name, relu=False):
        off, width = seg[name]                      # static, tile-aligned offsets
        return dense(x, w_hid_ref[:, off:off + width],
                     b_hid_ref[:, off:off + width], relu)

    def attention(q, k, v):
        # q/k/v: flat [bs, hp].  1/sqrt(H) is already folded into Q's weights.
        qb = q.reshape(block_b, seq, hp).astype(jnp.bfloat16)
        kb = k.reshape(block_b, seq, hp).astype(jnp.bfloat16)
        vb = v.reshape(block_b, seq, hp).astype(jnp.bfloat16)
        s = jnp.einsum('bqd,bkd->bqk', qb, kb, preferred_element_type=jnp.float32)
        s = s - jnp.max(s, axis=-1, keepdims=True)         # stable softmax (f32)
        p = jnp.exp(s)
        attn = p / jnp.sum(p, axis=-1, keepdims=True)       # exact divide
        o = jnp.einsum('bqk,bkd->bqd', attn.astype(jnp.bfloat16), vb,
                       preferred_element_type=jnp.float32)
        return o.reshape(bs, hp), attn

    # --- AudioEncoder: 2x (Linear+ReLU[+Dropout=id]) -> local attn -> proj ---
    x = dense(audio_ref[...].reshape(bs, -1), w_in_ref[...], b_in_ref[...],
              relu=True)
    x = seg_dense(x, 'a_fc1', relu=True)
    qkv = seg_dense(x, 'a_qkv')
    att, a_local = attention(qkv[:, :hp], qkv[:, hp:2 * hp], qkv[:, 2 * hp:])
    audio_encoded = seg_dense(att, 'a_proj')

    # --- TextEncoder: local attn over hidden states -> proj (+dropout=id) ----
    qkv = seg_dense(text_ref[...].reshape(bs, hp), 't_qkv')
    att, t_local = attention(qkv[:, :hp], qkv[:, hp:2 * hp], qkv[:, 2 * hp:])
    text_encoded = seg_dense(att, 't_proj')

    # --- CrossModalAttention --------------------------------------------------
    a_qkv = seg_dense(audio_encoded, 'cma_a')    # audio {q, k, v}
    t_qkv = seg_dense(text_encoded, 'cma_t')     # text  {q, k, v}
    a_att_t, a2t = attention(a_qkv[:, :hp], t_qkv[:, hp:2 * hp], t_qkv[:, 2 * hp:])
    t_att_a, t2a = attention(t_qkv[:, :hp], a_qkv[:, hp:2 * hp], a_qkv[:, 2 * hp:])

    audio_feats = audio_encoded + a_att_t
    text_feats = text_encoded + t_att_a

    # --- GlobalInterModalAttention --------------------------------------------
    # TODO(synk): torch concatenates on the *sequence* dim, which is
    # shape-inconsistent with its Linear(2H, H); we use the feature-dim
    # interpretation (requires Sa == St).  The 2H->3H projection is computed as
    # two H->3H matmuls summed so no lane-concat is materialized.
    g_qkv = seg_dense(audio_feats, 'g_a') + seg_dense(text_feats, 'g_t')
    g_feat, g_attn = attention(g_qkv[:, :hp], g_qkv[:, hp:2 * hp], g_qkv[:, 2 * hp:])

    # --- mean pool over sequence + classifier ---------------------------------
    pooled = jnp.mean(g_feat.reshape(block_b, seq, hp), axis=1)     # [block_b, Hp]
    hcls = seg_dense(pooled, 'cls0', relu=True)                     # dropout == id
    logits_ref[...] = dense(hcls, w_cls1_ref[...], b_cls1_ref[...])

    # --- lane-dense attention-map slab [block_b, S, 5*slot] --------------------
    def pad_lanes(a):
        padw = slot - a.shape[-1]
        if padw == 0:
            return a
        return jnp.concatenate(
            [a, jnp.zeros(a.shape[:-1] + (padw,), a.dtype)], axis=-1)

    attn_ref[...] = jnp.concatenate(
        [pad_lanes(a_local), pad_lanes(t_local), pad_lanes(a2t),
         pad_lanes(t2a), pad_lanes(g_attn)], axis=-1)


# ----------------------------------------------------------------------------
# Parameter construction (deterministic, torch.nn.Linear-style uniform init)
# ----------------------------------------------------------------------------
def _init_linear(key, din, dout):
    kw, kb = jax.random.split(key)
    bound = 1.0 / float(din) ** 0.5
    w = jax.random.uniform(kw, (dout, din), jnp.float32, -bound, bound)
    b = jax.random.uniform(kb, (1, dout), jnp.float32, -bound, bound)
    return (w, b)


def init_params(key, audio_in, hidden, num_classes, vocab):
    layer_dims = [
        # AudioEncoder
        ('audio_fc0', audio_in, hidden),
        ('audio_fc1', hidden, hidden),
        ('audio_la_q', hidden, hidden),
        ('audio_la_k', hidden, hidden),
        ('audio_la_v', hidden, hidden),
        ('audio_proj', hidden, hidden),
        # TextEncoder (local attention + projection)
        ('text_la_q', hidden, hidden),
        ('text_la_k', hidden, hidden),
        ('text_la_v', hidden, hidden),
        ('text_proj', hidden, hidden),
        # CrossModalAttention
        ('cma_audio_q', hidden, hidden),
        ('cma_text_k', hidden, hidden),
        ('cma_text_v', hidden, hidden),
        ('cma_text_q', hidden, hidden),
        ('cma_audio_k', hidden, hidden),
        ('cma_audio_v', hidden, hidden),
        # GlobalInterModalAttention (Linear(2H, H) as declared in __init__)
        ('glob_q', 2 * hidden, hidden),
        ('glob_k', 2 * hidden, hidden),
        ('glob_v', 2 * hidden, hidden),
        # EmotionClassifier
        ('cls_fc0', hidden, hidden // 2),
        ('cls_fc1', hidden // 2, num_classes),
    ]
    keys = jax.random.split(key, len(layer_dims) + 1)
    params = {name: _init_linear(k, din, dout)
              for (name, din, dout), k in zip(layer_dims, keys[:-1])}
    # TODO(synk): pretrained DistilBERT (AutoModel) has no Pallas equivalent;
    # replaced by a deterministic embedding table producing last_hidden_state.
    params['text_embed'] = 0.02 * jax.random.normal(
        keys[-1], (vocab, hidden), jnp.float32)
    return params


# ----------------------------------------------------------------------------
# Weight packing: transpose to [Din, Dout], zero-pad hidden to Hp (multiple of
# 128), fold 1/sqrt(H) into Q, merge everything into a few slabs, cast to bf16.
# ----------------------------------------------------------------------------
def _pack_params(params, hidden, audio_in, num_classes):
    H = hidden
    Hp = _round_up(H, 128)
    H2p = _round_up(max(H // 2, 1), 128)
    inv_scale = 1.0 / float(H) ** 0.5

    def wt(name):
        w, b = params[name]
        return w.T, b                                # [Din, Dout], [1, Dout]

    def pad_w(w, rows, cols):
        return jnp.pad(w, ((0, rows - w.shape[0]), (0, cols - w.shape[1])))

    def pad_b(b, cols):
        return jnp.pad(b, ((0, 0), (0, cols - b.shape[1])))

    def qkv_block(qn, kn, vn):
        wq, bq = wt(qn); wk, bk = wt(kn); wv, bv = wt(vn)
        w = jnp.concatenate([pad_w(wq * inv_scale, Hp, Hp),   # scale folded in Q
                             pad_w(wk, Hp, Hp),
                             pad_w(wv, Hp, Hp)], axis=1)
        b = jnp.concatenate([pad_b(bq * inv_scale, Hp),
                             pad_b(bk, Hp),
                             pad_b(bv, Hp)], axis=1)
        return w, b

    # Global attention: split the Linear(2H, ...) rows into audio / text halves.
    wgq, bgq = wt('glob_q'); wgk, bgk = wt('glob_k'); wgv, bgv = wt('glob_v')

    def g_half(w, lo):
        return pad_w(w[lo:lo + H, :], Hp, Hp)

    w_g_a = jnp.concatenate([g_half(wgq, 0) * inv_scale, g_half(wgk, 0),
                             g_half(wgv, 0)], axis=1)
    w_g_t = jnp.concatenate([g_half(wgq, H) * inv_scale, g_half(wgk, H),
                             g_half(wgv, H)], axis=1)
    b_g_a = jnp.concatenate([pad_b(bgq * inv_scale, Hp), pad_b(bgk, Hp),
                             pad_b(bgv, Hp)], axis=1)
    b_g_t = jnp.zeros_like(b_g_a)                    # bias added once (via g_a)

    blocks = []
    w, b = wt('audio_fc1'); blocks.append(('a_fc1', pad_w(w, Hp, Hp), pad_b(b, Hp)))
    blocks.append(('a_qkv',) + qkv_block('audio_la_q', 'audio_la_k', 'audio_la_v'))
    w, b = wt('audio_proj'); blocks.append(('a_proj', pad_w(w, Hp, Hp), pad_b(b, Hp)))
    blocks.append(('t_qkv',) + qkv_block('text_la_q', 'text_la_k', 'text_la_v'))
    w, b = wt('text_proj'); blocks.append(('t_proj', pad_w(w, Hp, Hp), pad_b(b, Hp)))
    blocks.append(('cma_a',) + qkv_block('cma_audio_q', 'cma_audio_k', 'cma_audio_v'))
    blocks.append(('cma_t',) + qkv_block('cma_text_q', 'cma_text_k', 'cma_text_v'))
    blocks.append(('g_a', w_g_a, b_g_a))
    blocks.append(('g_t', w_g_t, b_g_t))
    w, b = wt('cls_fc0'); blocks.append(('cls0', pad_w(w, Hp, H2p), pad_b(b, H2p)))

    seg, ws, bs, off = {}, [], [], 0
    for name, w, b in blocks:
        width = w.shape[1]
        seg[name] = (off, width)
        ws.append(w); bs.append(b)
        off += width

    w_hid = jnp.concatenate(ws, axis=1).astype(jnp.bfloat16)   # [Hp, TOT] bf16
    b_hid = jnp.concatenate(bs, axis=1)                        # [1, TOT]  f32

    w0, b0 = wt('audio_fc0')
    w_in = pad_w(w0, audio_in, Hp).astype(jnp.bfloat16)        # [audio_in, Hp]
    b_in = pad_b(b0, Hp)

    w1, b1 = wt('cls_fc1')
    w_cls1 = pad_w(w1, H2p, num_classes).astype(jnp.bfloat16)  # [H2p, NC]
    b_cls1 = b1

    return (w_in, b_in, w_hid, b_hid, w_cls1, b_cls1), seg, Hp


# ----------------------------------------------------------------------------
# MERHAN forward pass (single fused pallas_call)
# ----------------------------------------------------------------------------
def merhan_forward(params, audio_features, input_ids, attention_mask):
    # TODO(synk): attention_mask only feeds the (replaced) transformer; unused.
    del attention_mask

    hidden = params['audio_proj'][0].shape[0]
    num_classes = params['cls_fc1'][0].shape[0]
    B, SA, audio_in = audio_features.shape
    ST = input_ids.shape[1]
    assert SA == ST, "feature-dim concat in global attention needs Sa == St"
    S = SA

    weights, seg, Hp = _pack_params(params, hidden, audio_in, num_classes)
    w_in, b_in, w_hid, b_hid, w_cls1, b_cls1 = weights

    # Embedding lookup (gather) stays in plain JAX glue; table padded to Hp.
    emb = jnp.pad(params['text_embed'],
                  ((0, 0), (0, Hp - params['text_embed'].shape[1])))
    text_hidden = emb[input_ids]                                # [B, S, Hp] f32

    block_b = _pick_block_b(B, S)
    num_blocks = B // block_b
    slot = _round_up(S, 128)            # lane-dense slot per attention map

    def seq_spec(d):
        return pl.BlockSpec((block_b, S, d), lambda i: (i, 0, 0))

    def const_spec(shape):
        idx = lambda i: (0,) * len(shape)
        if num_blocks > 1:
            # Weights never change across grid steps: single-buffer them
            # (double-buffering constants is pure VMEM waste, esp. on v7x).
            try:
                return pl.BlockSpec(shape, idx, pipeline_mode=pl.Buffered(1))
            except TypeError:   # older jax without pipeline_mode
                pass
        return pl.BlockSpec(shape, idx)

    in_specs = ([seq_spec(audio_in), seq_spec(Hp)]
                + [const_spec(a.shape)
                   for a in (w_in, b_in, w_hid, b_hid, w_cls1, b_cls1)])

    out_shape = (
        jax.ShapeDtypeStruct((num_blocks, block_b, num_classes), jnp.float32),
        jax.ShapeDtypeStruct((B, S, 5 * slot), jnp.float32),
    )
    out_specs = (
        pl.BlockSpec((pl.Squeezed(), block_b, num_classes), lambda i: (i, 0, 0)),
        pl.BlockSpec((block_b, S, 5 * slot), lambda i: (i, 0, 0)),
    )

    kernel = functools.partial(_merhan_kernel, seg=seg, hp=Hp,
                               block_b=block_b, seq=S, slot=slot)

    logits3, attn_slab = pl.pallas_call(
        kernel,
        out_shape=out_shape,
        grid=(num_blocks,),
        in_specs=in_specs,
        out_specs=out_specs,
        compiler_params=pltpu.CompilerParams(
            dimension_semantics=("parallel",),        # batch blocks across TCs
            vmem_limit_bytes=48 * 1024 * 1024),       # explicit VMEM budget
    )(audio_features, text_hidden, w_in, b_in, w_hid, b_hid, w_cls1, b_cls1)

    logits = logits3.reshape(B, num_classes)
    attn_dict = {
        'audio_local_attention':   attn_slab[:, :, 0 * slot:0 * slot + S],
        'text_local_attention':    attn_slab[:, :, 1 * slot:1 * slot + S],
        'audio_to_text_attention': attn_slab[:, :, 2 * slot:2 * slot + S],
        'text_to_audio_attention': attn_slab[:, :, 3 * slot:3 * slot + S],
        'global_attention':        attn_slab[:, :, 4 * slot:4 * slot + S],
    }
    return logits, attn_dict


# ----------------------------------------------------------------------------
# Driver
# ----------------------------------------------------------------------------
if __name__ == "__main__":
    B = 2            # batch
    SA = 8           # audio sequence length
    ST = 8           # text sequence length (== SA, see TODO above)
    AUDIO_IN = 16    # audio_input_dim
    HIDDEN = 32      # hidden_dim
    NUM_CLASSES = 7
    VOCAB = 100

    root = jax.random.PRNGKey(0)
    k_params, k_audio, k_ids = jax.random.split(root, 3)

    params = init_params(k_params, AUDIO_IN, HIDDEN, NUM_CLASSES, VOCAB)
    audio_features = jax.random.normal(k_audio, (B, SA, AUDIO_IN), jnp.float32)
    input_ids = jax.random.randint(k_ids, (B, ST), 0, VOCAB, jnp.int32)
    attention_mask = jnp.ones((B, ST), jnp.int32)

    fwd = jax.jit(merhan_forward)
    logits, attns = fwd(params, audio_features, input_ids, attention_mask)
    jax.block_until_ready(logits)
    jax.block_until_ready(attns)

    assert logits.shape == (B, NUM_CLASSES)
    assert attns['audio_local_attention'].shape == (B, SA, SA)
    assert attns['text_local_attention'].shape == (B, ST, ST)
    assert attns['audio_to_text_attention'].shape == (B, SA, ST)
    assert attns['text_to_audio_attention'].shape == (B, ST, SA)
    assert attns['global_attention'].shape == (B, SA, SA)
    assert bool(jnp.all(jnp.isfinite(logits)))
    # softmax rows of every attention map must sum to 1 (exact divide)
    row_sums = jnp.sum(attns['global_attention'], axis=-1)
    assert bool(jnp.all(jnp.abs(row_sums - 1.0) < 1e-4))

    print("KERNEL_OK")
</pallas_src>

<mosaic_0001>
module attributes {stable_mosaic.version = 11 : i64} {
  func.func @_merhan_kernel(%arg0: i32, %arg1: memref<2x8x16xf32, #tpu.memory_space<vmem>>, %arg2: memref<2x8x128xf32, #tpu.memory_space<vmem>>, %arg3: memref<16x128xbf16, #tpu.memory_space<vmem>>, %arg4: memref<1x128xf32, #tpu.memory_space<vmem>>, %arg5: memref<128x2816xbf16, #tpu.memory_space<vmem>>, %arg6: memref<1x2816xf32, #tpu.memory_space<vmem>>, %arg7: memref<128x7xbf16, #tpu.memory_space<vmem>>, %arg8: memref<1x7xf32, #tpu.memory_space<vmem>>, %arg9: memref<1x2x7xf32, #tpu.memory_space<vmem>>, %arg10: memref<2x8x640xf32, #tpu.memory_space<vmem>>) attributes {dimension_semantics = [#tpu.dimension_semantics<parallel>], iteration_bounds = array<i64: 1>, scalar_prefetch = 0 : i64, scratch_operands = 0 : i64, tpu.core_type = #tpu.core_type<tc>, window_params = [{transform_indices = @transform_0, window_bounds = array<i64: 2, 8, 16>}, {transform_indices = @transform_1, window_bounds = array<i64: 2, 8, 128>}, {pipeline_mode = #tpu.pipeline_mode<synchronous>, transform_indices = @transform_2, window_bounds = array<i64: 16, 128>}, {pipeline_mode = #tpu.pipeline_mode<synchronous>, transform_indices = @transform_3, window_bounds = array<i64: 1, 128>}, {pipeline_mode = #tpu.pipeline_mode<synchronous>, transform_indices = @transform_4, window_bounds = array<i64: 128, 2816>}, {pipeline_mode = #tpu.pipeline_mode<synchronous>, transform_indices = @transform_5, window_bounds = array<i64: 1, 2816>}, {pipeline_mode = #tpu.pipeline_mode<synchronous>, transform_indices = @transform_6, window_bounds = array<i64: 128, 7>}, {pipeline_mode = #tpu.pipeline_mode<synchronous>, transform_indices = @transform_7, window_bounds = array<i64: 1, 7>}, {transform_indices = @transform_8, window_bounds = array<i64: 1, 2, 7>}, {transform_indices = @transform_9, window_bounds = array<i64: 2, 8, 640>}]} {
    %c0 = arith.constant 0 : index
    %c0_0 = arith.constant 0 : index
    %c0_1 = arith.constant 0 : index
    %0 = vector.load %arg1[%c0, %c0_0, %c0_1] : memref<2x8x16xf32, #tpu.memory_space<vmem>>, vector<2x8x16xf32>
    %1 = vector.shape_cast %0 : vector<2x8x16xf32> to vector<16x16xf32>
    %c0_2 = arith.constant 0 : index
    %c0_3 = arith.constant 0 : index
    %2 = vector.load %arg3[%c0_2, %c0_3] : memref<16x128xbf16, #tpu.memory_space<vmem>>, vector<16x128xbf16>
    %c0_4 = arith.constant 0 : index
    %c0_5 = arith.constant 0 : index
    %3 = vector.load %arg4[%c0_4, %c0_5] : memref<1x128xf32, #tpu.memory_space<vmem>>, vector<1x128xf32>
    %4 = arith.truncf %1 : vector<16x16xf32> to vector<16x16xbf16>
    %cst = arith.constant dense<0.000000e+00> : vector<16x128xf32>
    %5 = tpu.matmul %4, %2, %cst {dimension_numbers = #tpu.dot_dimension_numbers<[1], [0], [0], [1], [0, 0, 1, 1], [], []>} : vector<16x16xbf16>, vector<16x128xbf16>, vector<16x128xf32> -> vector<16x128xf32>
    %6 = vector.broadcast %3 : vector<1x128xf32> to vector<16x128xf32>
    %7 = arith.addf %5, %6 : vector<16x128xf32>
    %cst_6 = arith.constant 0.000000e+00 : f32
    %8 = vector.broadcast %cst_6 : f32 to vector<16x128xf32>
    %9 = arith.maximumf %7, %8 : vector<16x128xf32>
    %c0_7 = arith.constant 0 : index
    %c0_8 = arith.constant 0 : index
    %10 = vector.load %arg5[%c0_7, %c0_8] : memref<128x2816xbf16, #tpu.memory_space<vmem>>, vector<128x128xbf16>
    %c0_9 = arith.constant 0 : index
    %c0_10 = arith.constant 0 : index
    %11 = vector.load %arg6[%c0_9, %c0_10] : memref<1x2816xf32, #tpu.memory_space<vmem>>, vector<1x128xf32>
    %12 = arith.truncf %9 : vector<16x128xf32> to vector<16x128xbf16>
    %cst_11 = arith.constant dense<0.000000e+00> : vector<16x128xf32>
    %13 = tpu.matmul %12, %10, %cst_11 {dimension_numbers = #tpu.dot_dimension_numbers<[1], [0], [0], [1], [0, 0, 1, 1], [], []>} : vector<16x128xbf16>, vector<128x128xbf16>, vector<16x128xf32> -> vector<16x128xf32>
    %14 = vector.broadcast %11 : vector<1x128xf32> to vector<16x128xf32>
    %15 = arith.addf %13, %14 : vector<16x128xf32>
    %cst_12 = arith.constant 0.000000e+00 : f32
    %16 = vector.broadcast %cst_12 : f32 to vector<16x128xf32>
    %17 = arith.maximumf %15, %16 : vector<16x128xf32>
    %c0_13 = arith.constant 0 : index
    %c128 = arith.constant 128 : index
    %18 = vector.load %arg5[%c0_13, %c128] : memref<128x2816xbf16, #tpu.memory_space<vmem>>, vector<128x384xbf16>
    %c0_14 = arith.constant 0 : index
    %c128_15 = arith.constant 128 : index
    %19 = vector.load %arg6[%c0_14, %c128_15] : memref<1x2816xf32, #tpu.memory_space<vmem>>, vector<1x384xf32>
    %20 = arith.truncf %17 : vector<16x128xf32> to vector<16x128xbf16>
    %cst_16 = arith.constant dense<0.000000e+00> : vector<16x384xf32>
    %21 = tpu.matmul %20, %18, %cst_16 {dimension_numbers = #tpu.dot_dimension_numbers<[1], [0], [0], [1], [0, 0, 1, 1], [], []>} : vector<16x128xbf16>, vector<128x384xbf16>, vector<16x384xf32> -> vector<16x384xf32>
    %22 = vector.broadcast %19 : vector<1x384xf32> to vector<16x384xf32>
    %23 = arith.addf %21, %22 : vector<16x384xf32>
    %24 = vector.extract_strided_slice %23 {offsets = [0, 0], sizes = [16, 128], strides = [1, 1]} : vector<16x384xf32> to vector<16x128xf32>
    %25 = vector.extract_strided_slice %23 {offsets = [0, 128], sizes = [16, 128], strides = [1, 1]} : vector<16x384xf32> to vector<16x128xf32>
    %26 = vector.extract_strided_slice %23 {offsets = [0, 256], sizes = [16, 128], strides = [1, 1]} : vector<16x384xf32> to vector<16x128xf32>
    %27 = vector.shape_cast %24 : vector<16x128xf32> to vector<2x8x128xf32>
    %28 = arith.truncf %27 : vector<2x8x128xf32> to vector<2x8x128xbf16>
    %29 = vector.shape_cast %25 : vector<16x128xf32> to vector<2x8x128xf32>
    %30 = arith.truncf %29 : vector<2x8x128xf32> to vector<2x8x128xbf16>
    %31 = vector.shape_cast %26 : vector<16x128xf32> to vector<2x8x128xf32>
    %32 = arith.truncf %31 : vector<2x8x128xf32> to vector<2x8x128xbf16>
    "tpu.trace_start"() <{level = 10 : i32, message = "bqd,bkd->bqk"}> : () -> ()
    %cst_17 = arith.constant dense<0.000000e+00> : vector<2x8x8xf32>
    %33 = tpu.matmul %28, %30, %cst_17 {dimension_numbers = #tpu.dot_dimension_numbers<[2], [2], [1], [1], [0, 0, 0, 1, 1, 1], [0], [0]>} : vector<2x8x128xbf16>, vector<2x8x128xbf16>, vector<2x8x8xf32> -> vector<2x8x8xf32>
    "tpu.trace_stop"() : () -> ()
    %cst_18 = arith.constant dense<0xFF800000> : vector<2x8xf32>
    %34 = vector.multi_reduction <maximumf>, %33, %cst_18 [2] : vector<2x8x8xf32> to vector<2x8xf32>
    %35 = vector.shape_cast %34 : vector<2x8xf32> to vector<2x8x1xf32>
    %36 = vector.broadcast %35 : vector<2x8x1xf32> to vector<2x8x8xf32>
    %37 = arith.subf %33, %36 : vector<2x8x8xf32>
    %38 = math.exp %37 : vector<2x8x8xf32>
    %cst_19 = arith.constant dense<0.000000e+00> : vector<2x8xf32>
    %39 = vector.multi_reduction <add>, %38, %cst_19 [2] : vector<2x8x8xf32> to vector<2x8xf32>
    %40 = vector.shape_cast %39 : vector<2x8xf32> to vector<2x8x1xf32>
    %41 = vector.broadcast %40 : vector<2x8x1xf32> to vector<2x8x8xf32>
    %42 = arith.divf %38, %41 : vector<2x8x8xf32>
    %43 = arith.truncf %42 : vector<2x8x8xf32> to vector<2x8x8xbf16>
    "tpu.trace_start"() <{level = 10 : i32, message = "bqk,bkd->bqd"}> : () -> ()
    %cst_20 = arith.constant dense<0.000000e+00> : vector<2x8x128xf32>
    %44 = tpu.matmul %43, %32, %cst_20 {dimension_numbers = #tpu.dot_dimension_numbers<[2], [1], [1], [2], [0, 0, 0, 1, 1, 2], [0], [0]>} : vector<2x8x8xbf16>, vector<2x8x128xbf16>, vector<2x8x128xf32> -> vector<2x8x128xf32>
    "tpu.trace_stop"() : () -> ()
    %45 = vector.shape_cast %44 : vector<2x8x128xf32> to vector<16x128xf32>
    %c0_21 = arith.constant 0 : index
    %c512 = arith.constant 512 : index
    %46 = vector.load %arg5[%c0_21, %c512] : memref<128x2816xbf16, #tpu.memory_space<vmem>>, vector<128x128xbf16>
    %c0_22 = arith.constant 0 : index
    %c512_23 = arith.constant 512 : index
    %47 = vector.load %arg6[%c0_22, %c512_23] : memref<1x2816xf32, #tpu.memory_space<vmem>>, vector<1x128xf32>
    %48 = arith.truncf %45 : vector<16x128xf32> to vector<16x128xbf16>
    %cst_24 = arith.constant dense<0.000000e+00> : vector<16x128xf32>
    %49 = tpu.matmul %48, %46, %cst_24 {dimension_numbers = #tpu.dot_dimension_numbers<[1], [0], [0], [1], [0, 0, 1, 1], [], []>} : vector<16x128xbf16>, vector<128x128xbf16>, vector<16x128xf32> -> vector<16x128xf32>
    %50 = vector.broadcast %47 : vector<1x128xf32> to vector<16x128xf32>
    %51 = arith.addf %49, %50 : vector<16x128xf32>
    %c0_25 = arith.constant 0 : index
    %c0_26 = arith.constant 0 : index
    %c0_27 = arith.constant 0 : index
    %52 = vector.load %arg2[%c0_25, %c0_26, %c0_27] : memref<2x8x128xf32, #tpu.memory_space<vmem>>, vector<2x8x128xf32>
    %53 = vector.shape_cast %52 : vector<2x8x128xf32> to vector<16x128xf32>
    %c0_28 = arith.constant 0 : index
    %c640 = arith.constant 640 : index
    %54 = vector.load %arg5[%c0_28, %c640] : memref<128x2816xbf16, #tpu.memory_space<vmem>>, vector<128x384xbf16>
    %c0_29 = arith.constant 0 : index
    %c640_30 = arith.constant 640 : index
    %55 = vector.load %arg6[%c0_29, %c640_30] : memref<1x2816xf32, #tpu.memory_space<vmem>>, vector<1x384xf32>
    %56 = arith.truncf %53 : vector<16x128xf32> to vector<16x128xbf16>
    %cst_31 = arith.constant dense<0.000000e+00> : vector<16x384xf32>
    %57 = tpu.matmul %56, %54, %cst_31 {dimension_numbers = #tpu.dot_dimension_numbers<[1], [0], [0], [1], [0, 0, 1, 1], [], []>} : vector<16x128xbf16>, vector<128x384xbf16>, vector<16x384xf32> -> vector<16x384xf32>
    %58 = vector.broadcast %55 : vector<1x384xf32> to vector<16x384xf32>
    %59 = arith.addf %57, %58 : vector<16x384xf32>
    %60 = vector.extract_strided_slice %59 {offsets = [0, 0], sizes = [16, 128], strides = [1, 1]} : vector<16x384xf32> to vector<16x128xf32>
    %61 = vector.extract_strided_slice %59 {offsets = [0, 128], sizes = [16, 128], strides = [1, 1]} : vector<16x384xf32> to vector<16x128xf32>
    %62 = vector.extract_strided_slice %59 {offsets = [0, 256], sizes = [16, 128], strides = [1, 1]} : vector<16x384xf32> to vector<16x128xf32>
    %63 = vector.shape_cast %60 : vector<16x128xf32> to vector<2x8x128xf32>
    %64 = arith.truncf %63 : vector<2x8x128xf32> to vector<2x8x128xbf16>
    %65 = vector.shape_cast %61 : vector<16x128xf32> to vector<2x8x128xf32>
    %66 = arith.truncf %65 : vector<2x8x128xf32> to vector<2x8x128xbf16>
    %67 = vector.shape_cast %62 : vector<16x128xf32> to vector<2x8x128xf32>
    %68 = arith.truncf %67 : vector<2x8x128xf32> to vector<2x8x128xbf16>
    "tpu.trace_start"() <{level = 10 : i32, message = "bqd,bkd->bqk"}> : () -> ()
    %cst_32 = arith.constant dense<0.000000e+00> : vector<2x8x8xf32>
    %69 = tpu.matmul %64, %66, %cst_32 {dimension_numbers = #tpu.dot_dimension_numbers<[2], [2], [1], [1], [0, 0, 0, 1, 1, 1], [0], [0]>} : vector<2x8x128xbf16>, vector<2x8x128xbf16>, vector<2x8x8xf32> -> vector<2x8x8xf32>
    "tpu.trace_stop"() : () -> ()
    %cst_33 = arith.constant dense<0xFF800000> : vector<2x8xf32>
    %70 = vector.multi_reduction <maximumf>, %69, %cst_33 [2] : vector<2x8x8xf32> to vector<2x8xf32>
    %71 = vector.shape_cast %70 : vector<2x8xf32> to vector<2x8x1xf32>
    %72 = vector.broadcast %71 : vector<2x8x1xf32> to vector<2x8x8xf32>
    %73 = arith.subf %69, %72 : vector<2x8x8xf32>
    %74 = math.exp %73 : vector<2x8x8xf32>
    %cst_34 = arith.constant dense<0.000000e+00> : vector<2x8xf32>
    %75 = vector.multi_reduction <add>, %74, %cst_34 [2] : vector<2x8x8xf32> to vector<2x8xf32>
    %76 = vector.shape_cast %75 : vector<2x8xf32> to vector<2x8x1xf32>
    %77 = vector.broadcast %76 : vector<2x8x1xf32> to vector<2x8x8xf32>
    %78 = arith.divf %74, %77 : vector<2x8x8xf32>
    %79 = arith.truncf %78 : vector<2x8x8xf32> to vector<2x8x8xbf16>
    "tpu.trace_start"() <{level = 10 : i32, message = "bqk,bkd->bqd"}> : () -> ()
    %cst_35 = arith.constant dense<0.000000e+00> : vector<2x8x128xf32>
    %80 = tpu.matmul %79, %68, %cst_35 {dimension_numbers = #tpu.dot_dimension_numbers<[2], [1], [1], [2], [0, 0, 0, 1, 1, 2], [0], [0]>} : vector<2x8x8xbf16>, vector<2x8x128xbf16>, vector<2x8x128xf32> -> vector<2x8x128xf32>
    "tpu.trace_stop"() : () -> ()
    %81 = vector.shape_cast %80 : vector<2x8x128xf32> to vector<16x128xf32>
    %c0_36 = arith.constant 0 : index
    %c1024 = arith.constant 1024 : index
    %82 = vector.load %arg5[%c0_36, %c1024] : memref<128x2816xbf16, #tpu.memory_space<vmem>>, vector<128x128xbf16>
    %c0_37 = arith.constant 0 : index
    %c1024_38 = arith.constant 1024 : index
    %83 = vector.load %arg6[%c0_37, %c1024_38] : memref<1x2816xf32, #tpu.memory_space<vmem>>, vector<1x128xf32>
    %84 = arith.truncf %81 : vector<16x128xf32> to vector<16x128xbf16>
    %cst_39 = arith.constant dense<0.000000e+00> : vector<16x128xf32>
    %85 = tpu.matmul %84, %82, %cst_39 {dimension_numbers = #tpu.dot_dimension_numbers<[1], [0], [0], [1], [0, 0, 1, 1], [], []>} : vector<16x128xbf16>, vector<128x128xbf16>, vector<16x128xf32> -> vector<16x128xf32>
    %86 = vector.broadcast %83 : vector<1x128xf32> to vector<16x128xf32>
    %87 = arith.addf %85, %86 : vector<16x128xf32>
    %c0_40 = arith.constant 0 : index
    %c1152 = arith.constant 1152 : index
    %88 = vector.load %arg5[%c0_40, %c1152] : memref<128x2816xbf16, #tpu.memory_space<vmem>>, vector<128x384xbf16>
    %c0_41 = arith.constant 0 : index
    %c1152_42 = arith.constant 1152 : index
    %89 = vector.load %arg6[%c0_41, %c1152_42] : memref<1x2816xf32, #tpu.memory_space<vmem>>, vector<1x384xf32>
    %90 = arith.truncf %51 : vector<16x128xf32> to vector<16x128xbf16>
    %cst_43 = arith.constant dense<0.000000e+00> : vector<16x384xf32>
    %91 = tpu.matmul %90, %88, %cst_43 {dimension_numbers = #tpu.dot_dimension_numbers<[1], [0], [0], [1], [0, 0, 1, 1], [], []>} : vector<16x128xbf16>, vector<128x384xbf16>, vector<16x384xf32> -> vector<16x384xf32>
    %92 = vector.broadcast %89 : vector<1x384xf32> to vector<16x384xf32>
    %93 = arith.addf %91, %92 : vector<16x384xf32>
    %c0_44 = arith.constant 0 : index
    %c1536 = arith.constant 1536 : index
    %94 = vector.load %arg5[%c0_44, %c1536] : memref<128x2816xbf16, #tpu.memory_space<vmem>>, vector<128x384xbf16>
    %c0_45 = arith.constant 0 : index
    %c1536_46 = arith.constant 1536 : index
    %95 = vector.load %arg6[%c0_45, %c1536_46] : memref<1x2816xf32, #tpu.memory_space<vmem>>, vector<1x384xf32>
    %96 = arith.truncf %87 : vector<16x128xf32> to vector<16x128xbf16>
    %cst_47 = arith.constant dense<0.000000e+00> : vector<16x384xf32>
    %97 = tpu.matmul %96, %94, %cst_47 {dimension_numbers = #tpu.dot_dimension_numbers<[1], [0], [0], [1], [0, 0, 1, 1], [], []>} : vector<16x128xbf16>, vector<128x384xbf16>, vector<16x384xf32> -> vector<16x384xf32>
    %98 = vector.broadcast %95 : vector<1x384xf32> to vector<16x384xf32>
    %99 = arith.addf %97, %98 : vector<16x384xf32>
    %100 = vector.extract_strided_slice %93 {offsets = [0, 0], sizes = [16, 128], strides = [1, 1]} : vector<16x384xf32> to vector<16x128xf32>
    %101 = vector.extract_strided_slice %99 {offsets = [0, 128], sizes = [16, 128], strides = [1, 1]} : vector<16x384xf32> to vector<16x128xf32>
    %102 = vector.extract_strided_slice %99 {offsets = [0, 256], sizes = [16, 128], strides = [1, 1]} : vector<16x384xf32> to vector<16x128xf32>
    %103 = vector.shape_cast %100 : vector<16x128xf32> to vector<2x8x128xf32>
    %104 = arith.truncf %103 : vector<2x8x128xf32> to vector<2x8x128xbf16>
    %105 = vector.shape_cast %101 : vector<16x128xf32> to vector<2x8x128xf32>
    %106 = arith.truncf %105 : vector<2x8x128xf32> to vector<2x8x128xbf16>
    %107 = vector.shape_cast %102 : vector<16x128xf32> to vector<2x8x128xf32>
    %108 = arith.truncf %107 : vector<2x8x128xf32> to vector<2x8x128xbf16>
    "tpu.trace_start"() <{level = 10 : i32, message = "bqd,bkd->bqk"}> : () -> ()
    %cst_48 = arith.constant dense<0.000000e+00> : vector<2x8x8xf32>
    %109 = tpu.matmul %104, %106, %cst_48 {dimension_numbers = #tpu.dot_dimension_numbers<[2], [2], [1], [1], [0, 0, 0, 1, 1, 1], [0], [0]>} : vector<2x8x128xbf16>, vector<2x8x128xbf16>, vector<2x8x8xf32> -> vector<2x8x8xf32>
    "tpu.trace_stop"() : () -> ()
    %cst_49 = arith.constant dense<0xFF800000> : vector<2x8xf32>
    %110 = vector.multi_reduction <maximumf>, %109, %cst_49 [2] : vector<2x8x8xf32> to vector<2x8xf32>
    %111 = vector.shape_cast %110 : vector<2x8xf32> to vector<2x8x1xf32>
    %112 = vector.broadcast %111 : vector<2x8x1xf32> to vector<2x8x8xf32>
    %113 = arith.subf %109, %112 : vector<2x8x8xf32>
    %114 = math.exp %113 : vector<2x8x8xf32>
    %cst_50 = arith.constant dense<0.000000e+00> : vector<2x8xf32>
    %115 = vector.multi_reduction <add>, %114, %cst_50 [2] : vector<2x8x8xf32> to vector<2x8xf32>
    %116 = vector.shape_cast %115 : vector<2x8xf32> to vector<2x8x1xf32>
    %117 = vector.broadcast %116 : vector<2x8x1xf32> to vector<2x8x8xf32>
    %118 = arith.divf %114, %117 : vector<2x8x8xf32>
    %119 = arith.truncf %118 : vector<2x8x8xf32> to vector<2x8x8xbf16>
    "tpu.trace_start"() <{level = 10 : i32, message = "bqk,bkd->bqd"}> : () -> ()
    %cst_51 = arith.constant dense<0.000000e+00> : vector<2x8x128xf32>
    %120 = tpu.matmul %119, %108, %cst_51 {dimension_numbers = #tpu.dot_dimension_numbers<[2], [1], [1], [2], [0, 0, 0, 1, 1, 2], [0], [0]>} : vector<2x8x8xbf16>, vector<2x8x128xbf16>, vector<2x8x128xf32> -> vector<2x8x128xf32>
    "tpu.trace_stop"() : () -> ()
    %121 = vector.shape_cast %120 : vector<2x8x128xf32> to vector<16x128xf32>
    %122 = vector.extract_strided_slice %99 {offsets = [0, 0], sizes = [16, 128], strides = [1, 1]} : vector<16x384xf32> to vector<16x128xf32>
    %123 = vector.extract_strided_slice %93 {offsets = [0, 128], sizes = [16, 128], strides = [1, 1]} : vector<16x384xf32> to vector<16x128xf32>
    %124 = vector.extract_strided_slice %93 {offsets = [0, 256], sizes = [16, 128], strides = [1, 1]} : vector<16x384xf32> to vector<16x128xf32>
    %125 = vector.shape_cast %122 : vector<16x128xf32> to vector<2x8x128xf32>
    %126 = arith.truncf %125 : vector<2x8x128xf32> to vector<2x8x128xbf16>
    %127 = vector.shape_cast %123 : vector<16x128xf32> to vector<2x8x128xf32>
    %128 = arith.truncf %127 : vector<2x8x128xf32> to vector<2x8x128xbf16>
    %129 = vector.shape_cast %124 : vector<16x128xf32> to vector<2x8x128xf32>
    %130 = arith.truncf %129 : vector<2x8x128xf32> to vector<2x8x128xbf16>
    "tpu.trace_start"() <{level = 10 : i32, message = "bqd,bkd->bqk"}> : () -> ()
    %cst_52 = arith.constant dense<0.000000e+00> : vector<2x8x8xf32>
    %131 = tpu.matmul %126, %128, %cst_52 {dimension_numbers = #tpu.dot_dimension_numbers<[2], [2], [1], [1], [0, 0, 0, 1, 1, 1], [0], [0]>} : vector<2x8x128xbf16>, vector<2x8x128xbf16>, vector<2x8x8xf32> -> vector<2x8x8xf32>
    "tpu.trace_stop"() : () -> ()
    %cst_53 = arith.constant dense<0xFF800000> : vector<2x8xf32>
    %132 = vector.multi_reduction <maximumf>, %131, %cst_53 [2] : vector<2x8x8xf32> to vector<2x8xf32>
    %133 = vector.shape_cast %132 : vector<2x8xf32> to vector<2x8x1xf32>
    %134 = vector.broadcast %133 : vector<2x8x1xf32> to vector<2x8x8xf32>
    %135 = arith.subf %131, %134 : vector<2x8x8xf32>
    %136 = math.exp %135 : vector<2x8x8xf32>
    %cst_54 = arith.constant dense<0.000000e+00> : vector<2x8xf32>
    %137 = vector.multi_reduction <add>, %136, %cst_54 [2] : vector<2x8x8xf32> to vector<2x8xf32>
    %138 = vector.shape_cast %137 : vector<2x8xf32> to vector<2x8x1xf32>
    %139 = vector.broadcast %138 : vector<2x8x1xf32> to vector<2x8x8xf32>
    %140 = arith.divf %136, %139 : vector<2x8x8xf32>
    %141 = arith.truncf %140 : vector<2x8x8xf32> to vector<2x8x8xbf16>
    "tpu.trace_start"() <{level = 10 : i32, message = "bqk,bkd->bqd"}> : () -> ()
    %cst_55 = arith.constant dense<0.000000e+00> : vector<2x8x128xf32>
    %142 = tpu.matmul %141, %130, %cst_55 {dimension_numbers = #tpu.dot_dimension_numbers<[2], [1], [1], [2], [0, 0, 0, 1, 1, 2], [0], [0]>} : vector<2x8x8xbf16>, vector<2x8x128xbf16>, vector<2x8x128xf32> -> vector<2x8x128xf32>
    "tpu.trace_stop"() : () -> ()
    %143 = vector.shape_cast %142 : vector<2x8x128xf32> to vector<16x128xf32>
    %144 = arith.addf %51, %121 : vector<16x128xf32>
    %145 = arith.addf %87, %143 : vector<16x128xf32>
    %c0_56 = arith.constant 0 : index
    %c1920 = arith.constant 1920 : index
    %146 = vector.load %arg5[%c0_56, %c1920] : memref<128x2816xbf16, #tpu.memory_space<vmem>>, vector<128x384xbf16>
    %c0_57 = arith.constant 0 : index
    %c1920_58 = arith.constant 1920 : index
    %147 = vector.load %arg6[%c0_57, %c1920_58] : memref<1x2816xf32, #tpu.memory_space<vmem>>, vector<1x384xf32>
    %148 = arith.truncf %144 : vector<16x128xf32> to vector<16x128xbf16>
    %cst_59 = arith.constant dense<0.000000e+00> : vector<16x384xf32>
    %149 = tpu.matmul %148, %146, %cst_59 {dimension_numbers = #tpu.dot_dimension_numbers<[1], [0], [0], [1], [0, 0, 1, 1], [], []>} : vector<16x128xbf16>, vector<128x384xbf16>, vector<16x384xf32> -> vector<16x384xf32>
    %150 = vector.broadcast %147 : vector<1x384xf32> to vector<16x384xf32>
    %151 = arith.addf %149, %150 : vector<16x384xf32>
    %c0_60 = arith.constant 0 : index
    %c2304 = arith.constant 2304 : index
    %152 = vector.load %arg5[%c0_60, %c2304] : memref<128x2816xbf16, #tpu.memory_space<vmem>>, vector<128x384xbf16>
    %c0_61 = arith.constant 0 : index
    %c2304_62 = arith.constant 2304 : index
    %153 = vector.load %arg6[%c0_61, %c2304_62] : memref<1x2816xf32, #tpu.memory_space<vmem>>, vector<1x384xf32>
    %154 = arith.truncf %145 : vector<16x128xf32> to vector<16x128xbf16>
    %cst_63 = arith.constant dense<0.000000e+00> : vector<16x384xf32>
    %155 = tpu.matmul %154, %152, %cst_63 {dimension_numbers = #tpu.dot_dimension_numbers<[1], [0], [0], [1], [0, 0, 1, 1], [], []>} : vector<16x128xbf16>, vector<128x384xbf16>, vector<16x384xf32> -> vector<16x384xf32>
    %156 = vector.broadcast %153 : vector<1x384xf32> to vector<16x384xf32>
    %157 = arith.addf %155, %156 : vector<16x384xf32>
    %158 = arith.addf %151, %157 : vector<16x384xf32>
    %159 = vector.extract_strided_slice %158 {offsets = [0, 0], sizes = [16, 128], strides = [1, 1]} : vector<16x384xf32> to vector<16x128xf32>
    %160 = vector.extract_strided_slice %158 {offsets = [0, 128], sizes = [16, 128], strides = [1, 1]} : vector<16x384xf32> to vector<16x128xf32>
    %161 = vector.extract_strided_slice %158 {offsets = [0, 256], sizes = [16, 128], strides = [1, 1]} : vector<16x384xf32> to vector<16x128xf32>
    %162 = vector.shape_cast %159 : vector<16x128xf32> to vector<2x8x128xf32>
    %163 = arith.truncf %162 : vector<2x8x128xf32> to vector<2x8x128xbf16>
    %164 = vector.shape_cast %160 : vector<16x128xf32> to vector<2x8x128xf32>
    %165 = arith.truncf %164 : vector<2x8x128xf32> to vector<2x8x128xbf16>
    %166 = vector.shape_cast %161 : vector<16x128xf32> to vector<2x8x128xf32>
    %167 = arith.truncf %166 : vector<2x8x128xf32> to vector<2x8x128xbf16>
    "tpu.trace_start"() <{level = 10 : i32, message = "bqd,bkd->bqk"}> : () -> ()
    %cst_64 = arith.constant dense<0.000000e+00> : vector<2x8x8xf32>
    %168 = tpu.matmul %163, %165, %cst_64 {dimension_numbers = #tpu.dot_dimension_numbers<[2], [2], [1], [1], [0, 0, 0, 1, 1, 1], [0], [0]>} : vector<2x8x128xbf16>, vector<2x8x128xbf16>, vector<2x8x8xf32> -> vector<2x8x8xf32>
    "tpu.trace_stop"() : () -> ()
    %cst_65 = arith.constant dense<0xFF800000> : vector<2x8xf32>
    %169 = vector.multi_reduction <maximumf>, %168, %cst_65 [2] : vector<2x8x8xf32> to vector<2x8xf32>
    %170 = vector.shape_cast %169 : vector<2x8xf32> to vector<2x8x1xf32>
    %171 = vector.broadcast %170 : vector<2x8x1xf32> to vector<2x8x8xf32>
    %172 = arith.subf %168, %171 : vector<2x8x8xf32>
    %173 = math.exp %172 : vector<2x8x8xf32>
    %cst_66 = arith.constant dense<0.000000e+00> : vector<2x8xf32>
    %174 = vector.multi_reduction <add>, %173, %cst_66 [2] : vector<2x8x8xf32> to vector<2x8xf32>
    %175 = vector.shape_cast %174 : vector<2x8xf32> to vector<2x8x1xf32>
    %176 = vector.broadcast %175 : vector<2x8x1xf32> to vector<2x8x8xf32>
    %177 = arith.divf %173, %176 : vector<2x8x8xf32>
    %178 = arith.truncf %177 : vector<2x8x8xf32> to vector<2x8x8xbf16>
    "tpu.trace_start"() <{level = 10 : i32, message = "bqk,bkd->bqd"}> : () -> ()
    %cst_67 = arith.constant dense<0.000000e+00> : vector<2x8x128xf32>
    %179 = tpu.matmul %178, %167, %cst_67 {dimension_numbers = #tpu.dot_dimension_numbers<[2], [1], [1], [2], [0, 0, 0, 1, 1, 2], [0], [0]>} : vector<2x8x8xbf16>, vector<2x8x128xbf16>, vector<2x8x128xf32> -> vector<2x8x128xf32>
    "tpu.trace_stop"() : () -> ()
    %180 = vector.shape_cast %179 : vector<2x8x128xf32> to vector<16x128xf32>
    %181 = vector.shape_cast %180 : vector<16x128xf32> to vector<2x8x128xf32>
    %cst_68 = arith.constant dense<0.000000e+00> : vector<2x128xf32>
    %182 = vector.multi_reduction <add>, %181, %cst_68 [1] : vector<2x8x128xf32> to vector<2x128xf32>
    %cst_69 = arith.constant 8.000000e+00 : f32
    %183 = vector.broadcast %cst_69 : f32 to vector<2x128xf32>
    %184 = arith.divf %182, %183 : vector<2x128xf32>
    %c0_70 = arith.constant 0 : index
    %c2688 = arith.constant 2688 : index
    %185 = vector.load %arg5[%c0_70, %c2688] : memref<128x2816xbf16, #tpu.memory_space<vmem>>, vector<128x128xbf16>
    %c0_71 = arith.constant 0 : index
    %c2688_72 = arith.constant 2688 : index
    %186 = vector.load %arg6[%c0_71, %c2688_72] : memref<1x2816xf32, #tpu.memory_space<vmem>>, vector<1x128xf32>
    %187 = arith.truncf %184 : vector<2x128xf32> to vector<2x128xbf16>
    %cst_73 = arith.constant dense<0.000000e+00> : vector<2x128xf32>
    %188 = tpu.matmul %187, %185, %cst_73 {dimension_numbers = #tpu.dot_dimension_numbers<[1], [0], [0], [1], [0, 0, 1, 1], [], []>} : vector<2x128xbf16>, vector<128x128xbf16>, vector<2x128xf32> -> vector<2x128xf32>
    %189 = vector.broadcast %186 : vector<1x128xf32> to vector<2x128xf32>
    %190 = arith.addf %188, %189 : vector<2x128xf32>
    %cst_74 = arith.constant 0.000000e+00 : f32
    %191 = vector.broadcast %cst_74 : f32 to vector<2x128xf32>
    %192 = arith.maximumf %190, %191 : vector<2x128xf32>
    %c0_75 = arith.constant 0 : index
    %c0_76 = arith.constant 0 : index
    %193 = vector.load %arg7[%c0_75, %c0_76] : memref<128x7xbf16, #tpu.memory_space<vmem>>, vector<128x7xbf16>
    %c0_77 = arith.constant 0 : index
    %c0_78 = arith.constant 0 : index
    %194 = vector.load %arg8[%c0_77, %c0_78] : memref<1x7xf32, #tpu.memory_space<vmem>>, vector<1x7xf32>
    %195 = arith.truncf %192 : vector<2x128xf32> to vector<2x128xbf16>
    %cst_79 = arith.constant dense<0.000000e+00> : vector<2x7xf32>
    %196 = tpu.matmul %195, %193, %cst_79 {dimension_numbers = #tpu.dot_dimension_numbers<[1], [0], [0], [1], [0, 0, 1, 1], [], []>} : vector<2x128xbf16>, vector<128x7xbf16>, vector<2x7xf32> -> vector<2x7xf32>
    %197 = vector.broadcast %194 : vector<1x7xf32> to vector<2x7xf32>
    %198 = arith.addf %196, %197 : vector<2x7xf32>
    %c0_80 = arith.constant 0 : index
    %c0_81 = arith.constant 0 : index
    %c0_82 = arith.constant 0 : index
    %199 = vector.load %arg9[%c0_80, %c0_81, %c0_82] : memref<1x2x7xf32, #tpu.memory_space<vmem>>, vector<1x2x7xf32>
    %200 = vector.shape_cast %199 : vector<1x2x7xf32> to vector<2x7xf32>
    %201 = vector.shape_cast %198 : vector<2x7xf32> to vector<1x2x7xf32>
    tpu.vector_store %arg9[%c0_80, %c0_81, %c0_82], %201 {strides = array<i32>} : memref<1x2x7xf32, #tpu.memory_space<vmem>>, vector<1x2x7xf32>,
    %cst_83 = arith.constant 0.000000e+00 : f32
    %202 = vector.broadcast %cst_83 : f32 to vector<2x8x120xf32>
    %203 = tpu.concatenate %42, %202 in 2 : vector<2x8x8xf32>, vector<2x8x120xf32> -> vector<2x8x128xf32>
    %cst_84 = arith.constant 0.000000e+00 : f32
    %204 = vector.broadcast %cst_84 : f32 to vector<2x8x120xf32>
    %205 = tpu.concatenate %78, %204 in 2 : vector<2x8x8xf32>, vector<2x8x120xf32> -> vector<2x8x128xf32>
    %cst_85 = arith.constant 0.000000e+00 : f32
    %206 = vector.broadcast %cst_85 : f32 to vector<2x8x120xf32>
    %207 = tpu.concatenate %118, %206 in 2 : vector<2x8x8xf32>, vector<2x8x120xf32> -> vector<2x8x128xf32>
    %cst_86 = arith.constant 0.000000e+00 : f32
    %208 = vector.broadcast %cst_86 : f32 to vector<2x8x120xf32>
    %209 = tpu.concatenate %140, %208 in 2 : vector<2x8x8xf32>, vector<2x8x120xf32> -> vector<2x8x128xf32>
    %cst_87 = arith.constant 0.000000e+00 : f32
    %210 = vector.broadcast %cst_87 : f32 to vector<2x8x120xf32>
    %211 = tpu.concatenate %177, %210 in 2 : vector<2x8x8xf32>, vector<2x8x120xf32> -> vector<2x8x128xf32>
    %212 = tpu.concatenate %203, %205, %207, %209, %211 in 2 : vector<2x8x128xf32>, vector<2x8x128xf32>, vector<2x8x128xf32>, vector<2x8x128xf32>, vector<2x8x128xf32> -> vector<2x8x640xf32>
    %c0_88 = arith.constant 0 : index
    %c0_89 = arith.constant 0 : index
    %c0_90 = arith.constant 0 : index
    %213 = vector.load %arg10[%c0_88, %c0_89, %c0_90] : memref<2x8x640xf32, #tpu.memory_space<vmem>>, vector<2x8x640xf32>
    tpu.vector_store %arg10[%c0_88, %c0_89, %c0_90], %212 {strides = array<i32>} : memref<2x8x640xf32, #tpu.memory_space<vmem>>, vector<2x8x640xf32>,
    return
  }
  func.func @transform_0(%arg0: i32) -> (i32, i32, i32) {
    %c0_i32 = arith.constant 0 : i32
    %c0_i32_0 = arith.constant 0 : i32
    %c0_i32_1 = arith.constant 0 : i32
    return %arg0, %c0_i32, %c0_i32_0 : i32, i32, i32
  }
  func.func @transform_1(%arg0: i32) -> (i32, i32, i32) {
    %c0_i32 = arith.constant 0 : i32
    %c0_i32_0 = arith.constant 0 : i32
    %c0_i32_1 = arith.constant 0 : i32
    return %arg0, %c0_i32, %c0_i32_0 : i32, i32, i32
  }
  func.func @transform_2(%arg0: i32) -> (i32, i32) {
    %c0_i32 = arith.constant 0 : i32
    %c0_i32_0 = arith.constant 0 : i32
    %c0_i32_1 = arith.constant 0 : i32
    return %c0_i32, %c0_i32_0 : i32, i32
  }
  func.func @transform_3(%arg0: i32) -> (i32, i32) {
    %c0_i32 = arith.constant 0 : i32
    %c0_i32_0 = arith.constant 0 : i32
    %c0_i32_1 = arith.constant 0 : i32
    return %c0_i32, %c0_i32_0 : i32, i32
  }
  func.func @transform_4(%arg0: i32) -> (i32, i32) {
    %c0_i32 = arith.constant 0 : i32
    %c0_i32_0 = arith.constant 0 : i32
    %c0_i32_1 = arith.constant 0 : i32
    return %c0_i32, %c0_i32_0 : i32, i32
  }
  func.func @transform_5(%arg0: i32) -> (i32, i32) {
    %c0_i32 = arith.constant 0 : i32
    %c0_i32_0 = arith.constant 0 : i32
    %c0_i32_1 = arith.constant 0 : i32
    return %c0_i32, %c0_i32_0 : i32, i32
  }
  func.func @transform_6(%arg0: i32) -> (i32, i32) {
    %c0_i32 = arith.constant 0 : i32
    %c0_i32_0 = arith.constant 0 : i32
    %c0_i32_1 = arith.constant 0 : i32
    return %c0_i32, %c0_i32_0 : i32, i32
  }
  func.func @transform_7(%arg0: i32) -> (i32, i32) {
    %c0_i32 = arith.constant 0 : i32
    %c0_i32_0 = arith.constant 0 : i32
    %c0_i32_1 = arith.constant 0 : i32
    return %c0_i32, %c0_i32_0 : i32, i32
  }
  func.func @transform_8(%arg0: i32) -> (i32, i32, i32) {
    %c0_i32 = arith.constant 0 : i32
    %c0_i32_0 = arith.constant 0 : i32
    %c0_i32_1 = arith.constant 0 : i32
    return %arg0, %c0_i32, %c0_i32_0 : i32, i32, i32
  }
  func.func @transform_9(%arg0: i32) -> (i32, i32, i32) {
    %c0_i32 = arith.constant 0 : i32
    %c0_i32_0 = arith.constant 0 : i32
    %c0_i32_1 = arith.constant 0 : i32
    return %arg0, %c0_i32, %c0_i32_0 : i32, i32, i32
  }
}

</mosaic_0001>

<bundles_post_ra>
// kernel: merhan_forward.1
= control target key start
LH: loop header
LB: loop body
LE: loop exit
PB: predicated region body
PF: predicated region fallthrough
CT: control target
= control target key end

     0   :  { %v4334_v1 = vmov 0.0   ;;  %vm51_vm0 = vcmask 130048   ;;  %vm4335_vm1 = vmmov 0   ;;  %s5359_s0 = inlined_call_operand.vmem [shape: f32[2,8,16], index: 0, kind: input, shape index: {}]   ;;  %s5360_s1 = inlined_call_operand.vmem [shape: f32[2,8,128], index: 1, kind: input, shape index: {}]   ;;  %s5361_s2 = inlined_call_operand.vmem [shape: bf16[16,128], index: 2, kind: input, shape index: {}]   ;;  %s5362_s3 = inlined_call_operand.vmem [shape: f32[1,128], index: 3, kind: input, shape index: {}]   ;;  %s5363_s4 = inlined_call_operand.vmem [shape: bf16[128,2816], index: 4, kind: input, shape index: {}]   ;;  %s5364_s5 = inlined_call_operand.vmem [shape: f32[1,2816], index: 5, kind: input, shape index: {}]   ;;  %s5365_s6 = inlined_call_operand.vmem [shape: bf16[128,7], index: 6, kind: input, shape index: {}]   ;;  %s5366_s7 = inlined_call_operand.vmem [shape: f32[1,7], index: 7, kind: input, shape index: {}]   ;;  %s5367_s8 = inlined_call_operand.hbm [shape: f32[1,2,7], index: 8, kind: output, shape index: {0}]   ;;  %s5368_s9 = inlined_call_operand.vmem [shape: f32[2,8,640], index: 9, kind: output, shape index: {1}]  }
   0x1   :  { %v4037_v0 = vld [vmem:[%s5361_s2] sm:$0xff]   ;;  %3667 = vmatprep.subr.bf16.mxu0 %v4334_v1  ;;  %v34_v3 = vld [vmem:[%s5359_s0 + $0x8] sm:$0xff]  ;;  %3673 = vmatprep.subr.bf16.mxu1 %v4334_v1 }
   0x2   :  { %v33_v2 = vld [vmem:[%s5359_s0] sm:$0xff]  ;;  %3668 = vmatpush3.bf16.msra.mxu0 %v4037_v0  ;;  %3669 = vmatprep.mubr.msk.bf16.mxu0 %vm4335_vm1, %v4334_v1  ;;  %v4039_v6 = vld [vmem:[%s5363_s4 + $0xb0] ss:$88 sps:$4 sm:$0xff]  }
   0x3   :  { %v38_v4 = vpack.c.bf16 %v34_v3, %v33_v2  ;;  %v4038_v5 = vld [vmem:[%s5363_s4] ss:$88 sps:$4 sm:$0xff]   ;;  %3689 = vmatprep.mubr.msk.bf16.mxu1 %vm4335_vm1, %v4334_v1  ;;  %v4041_v8 = vld [vmem:[%s5363_s4 + $0x210] ss:$88 sps:$4 sm:$0xff]  }
   0x4   :  { %3674 = vmatpush3.bf16.msra.mxu1 %v4038_v5  ;;  %v4040_v7 = vld [vmem:[%s5363_s4 + $0x160] ss:$88 sps:$4 sm:$0xff]   ;;  %v4043_v10 = vld [vmem:[%s5363_s4 + $0x370] ss:$88 sps:$4 sm:$0xff]  }
   0x5   :  { %3670 = vmatmul.mubr.msk.bf16.vlgmr.msra.gmra.mrb[0].mxu0 %vm51_vm0, %v38_v4  ;;  %3675 = vmatprep.subr.bf16.mxu1 %v4334_v1  ;;  %v4042_v9 = vld [vmem:[%s5363_s4 + $0x2c0] ss:$88 sps:$4 sm:$0xff]   ;;  %v4045_v12 = vld [vmem:[%s5363_s4 + $0x4d0] ss:$88 sps:$4 sm:$0xff]  }
   0x6   :  { %v4044_v11 = vld [vmem:[%s5363_s4 + $0x420] ss:$88 sps:$4 sm:$0xff]  }
   0x8   :  { %3676 = vmatpush3.bf16.msra.mxu1 %v4039_v6 }
   0x9   :  { %3677 = vmatprep.subr.bf16.mxu1 %v4334_v1 }
   0xc   :  { %3678 = vmatpush3.bf16.msra.mxu1 %v4040_v7 }
   0xd   :  { %3679 = vmatprep.subr.bf16.mxu1 %v4334_v1 }
  0x10   :  { %3680 = vmatpush3.bf16.msra.mxu1 %v4041_v8 }
  0x11   :  { %3681 = vmatprep.subr.bf16.mxu1 %v4334_v1 }
  0x14   :  { %3682 = vmatpush3.bf16.msra.mxu1 %v4042_v9 }
  0x15   :  { %3683 = vmatprep.subr.bf16.mxu1 %v4334_v1 }
  0x18   :  { %3684 = vmatpush3.bf16.msra.mxu1 %v4043_v10 }
  0x19   :  { %3685 = vmatprep.subr.bf16.mxu1 %v4334_v1 }
  0x1c   :  { %3686 = vmatpush3.bf16.msra.mxu1 %v4044_v11 }
  0x1d   :  { %3687 = vmatprep.subr.bf16.mxu1 %v4334_v1 }
  0x20   :  { %3688 = vmatpush3.bf16.msra.mxu1 %v4045_v12 }
  0x21   :  { %3693 = vmatprep.subr.bf16.mxu1 %v4334_v1 }
  0x22   :  { %15 = vsyncpa [#allocation3], 0  ;;  %v4046_v13 = vld [vmem:[%s5363_s4 + $0x4] ss:$88 sps:$4 sm:$0xff]   ;;  %v4048_v14 = vld [vmem:[%s5363_s4 + $0x8] ss:$88 sps:$4 sm:$0xff]   ;;  %v248_v58 = vlaneseq }
  0x23   :  { %v4052_v15 = vld [vmem:[%s5363_s4 + $0xb8] ss:$88 sps:$4 sm:$0xff]   ;;  %391 = vmatprep.subr.bf16.mxu0 %v4048_v14  ;;  %v4050_v16 = vld [vmem:[%s5363_s4 + $0xb4] ss:$88 sps:$4 sm:$0xff]   ;;  %v4056_v17 = vld [vmem:[%s5363_s4 + $0x168] ss:$88 sps:$4 sm:$0xff]  }
  0x24   :  { %392 = vmatpush1.bf16.msra.mxu0 %v4046_v13  ;;  %v4054_v18 = vld [vmem:[%s5363_s4 + $0x164] ss:$88 sps:$4 sm:$0xff]   ;;  %v4060_v19 = vld [vmem:[%s5363_s4 + $0x218] ss:$88 sps:$4 sm:$0xff]   ;;  %v4058_v20 = vld [vmem:[%s5363_s4 + $0x214] ss:$88 sps:$4 sm:$0xff]  }
  0x25   :  { %393 = vmatprep.subr.bf16.mxu0 %v4052_v15  ;;  %v4064_v21 = vld [vmem:[%s5363_s4 + $0x2c8] ss:$88 sps:$4 sm:$0xff]   ;;  %v4062_v22 = vld [vmem:[%s5363_s4 + $0x2c4] ss:$88 sps:$4 sm:$0xff]   ;;  %v4068_v23 = vld [vmem:[%s5363_s4 + $0x378] ss:$88 sps:$4 sm:$0xff]  }
  0x26   :  { %v4066_v24 = vld [vmem:[%s5363_s4 + $0x374] ss:$88 sps:$4 sm:$0xff]   ;;  %v3324_v25 = vld [vmem:[%s5362_s3] ss:$0 sm:$0xff]  ;;  %v4070_v42 = vld [vmem:[%s5363_s4 + $0x424] ss:$88 sps:$4 sm:$0xff]  }
  0x27   :  { %v4049_v34 = vld [vmem:[%s5363_s4 + $0xc] ss:$88 sps:$4 sm:$0xff]   ;;  %v4053_v36 = vld [vmem:[%s5363_s4 + $0xbc] ss:$88 sps:$4 sm:$0xff]   ;;  %v4072_v41 = vld [vmem:[%s5363_s4 + $0x428] ss:$88 sps:$4 sm:$0xff]  }
  0x28   :  { %394 = vmatpush1.bf16.msra.mxu0 %v4050_v16  ;;  %v4057_v37 = vld [vmem:[%s5363_s4 + $0x16c] ss:$88 sps:$4 sm:$0xff]   ;;  %v4061_v38 = vld [vmem:[%s5363_s4 + $0x21c] ss:$88 sps:$4 sm:$0xff]   ;;  %v4076_v44 = vld [vmem:[%s5363_s4 + $0x4d8] ss:$88 sps:$4 sm:$0xff]  }
  0x29   :  { %395 = vmatprep.subr.bf16.mxu0 %v4056_v17  ;;  %v4065_v39 = vld [vmem:[%s5363_s4 + $0x2cc] ss:$88 sps:$4 sm:$0xff]   ;;  %v4069_v40 = vld [vmem:[%s5363_s4 + $0x37c] ss:$88 sps:$4 sm:$0xff]   ;;  %v4336_v47 = vmov 0   ;;  %v249_v59 = vshrl.u32 %v248_v58, 7 }
  0x2a   :  { %v4073_v43 = vld [vmem:[%s5363_s4 + $0x42c] ss:$88 sps:$4 sm:$0xff]   ;;  %v4077_v46 = vld [vmem:[%s5363_s4 + $0x4dc] ss:$88 sps:$4 sm:$0xff]   ;;  %423 = vmatprep.mubr.bf16.mxu0 %v4336_v47  ;;  %v3327_v48 = vld [vmem:[%s5364_s5] ss:$0 sm:$0xff] }
  0x2b   :  { %v4074_v45 = vld [vmem:[%s5363_s4 + $0x4d4] ss:$88 sps:$4 sm:$0xff]   ;;  %v4529_v60 = vsub.s32 1, %v249_v59  ;;  %v245_v61 = vld [vmem:[%s5364_s5 + $0x1] sm:$0x7]  ;;  %v4534_v62 = vsub.s32 2, %v249_v59 }
  0x2c   :  { %396 = vmatpush1.bf16.msra.mxu0 %v4054_v18  ;;  %v4537_v0 = vsub.s32 0, %v249_v59  ;;  %vm589_vm2 = vcmask 1043456   ;;  %vm561_vm3 = vcmask 64512   ;;  %vm3079_vm4 = vcmask 1041409   ;;  %s4337_s10 = smov [#allocation2]  }
  0x2d   :  { %397 = vmatprep.subr.bf16.mxu0 %v4060_v19  ;;  %v255_v63 = vrot.slane %v245_v61, %v4529_v60  ;;  %v259_v4 = vrot.slane %v245_v61, %v4534_v62  ;;  %s3312_s11 = sshll.u32 %s4337_s10, 4  ;;  %vm3284_vm5 = vcmask 50176   ;;  %s3313_s11 = int_to_ptr.vmem [resolvable:$true] %s3312_s11 }
  0x2e   :  { %v251_v10 = vrot.slane %v245_v61, %v4537_v0  ;;  %p4315_p1 = scmp.lt.s32.totalorder %s3313_s11, %s3313_s11 }
  0x30   :  { %398 = vmatpush1.bf16.msra.mxu0 %v4058_v20 }
  0x31   :  { %399 = vmatprep.subr.bf16.mxu0 %v4064_v21 }
  0x34   :  { %400 = vmatpush1.bf16.msra.mxu0 %v4062_v22 }
  0x35   :  { %401 = vmatprep.subr.bf16.mxu0 %v4068_v23 }
  0x38   :  { %402 = vmatpush1.bf16.msra.mxu0 %v4066_v24 }
  0x39   :  { %403 = vmatprep.subr.bf16.mxu0 %v4072_v41 }
  0x3c   :  { %404 = vmatpush1.bf16.msra.mxu0 %v4070_v42 }
  0x3d   :  { %405 = vmatprep.subr.bf16.mxu0 %v4076_v44  ;;  %v4102_v44 = vld [vmem:[%s5363_s4 + $0x10] ss:$88 sps:$4 sm:$0xff]  }
  0x40   :  { %406 = vmatpush1.bf16.msra.mxu0 %v4074_v45  ;;  %v4103_v45 = vld [vmem:[%s5363_s4 + $0xc0] ss:$88 sps:$4 sm:$0xff]  }
  0x41   :  { %3713 = vmatprep.subr.bf16.mxu0 %v4334_v1 }
  0xd8   :  { %v89_v26 = vpop.f32.mrb[0].mxu0 }
  0xd9   :  { %v90_v27 = vadd.f32 %v3324_v25, %v89_v26  ;;  %v3671_v28 = vpop.f32.mrb[1].mxu0 }
  0xda   :  { %v92_v29 = vpop.f32.mrb[2].mxu0 }
  0xdb   :  { %v93_v30 = vadd.f32 %v3324_v25, %v92_v29  ;;  %v3672_v31 = vpop.f32.mrb[3].mxu0  ;;  %v96_v32 = vmax.f32 %v90_v27, 0.0 }
  0xdd   :  { %v97_v33 = vmax.f32 %v93_v30, 0.0 }
  0xdf   :  { %v115_v35 = vpack.c.bf16 %v97_v33, %v96_v32 }
  0xe1   :  { %3690 = vmatmul.mubr.bf16.vlgmr.msra.gmra.mrb[0].mxu1 %v115_v35 }
  0xe2   :  { %3694 = vmatpush3.bf16.msra.mxu1 %v4049_v34  ;;  %3709 = vmatprep.mubr.msk.bf16.mxu1 %vm4335_vm1, %v4334_v1 }
  0xe3   :  { %3695 = vmatprep.subr.bf16.mxu1 %v4334_v1 }
  0xe6   :  { %3696 = vmatpush3.bf16.msra.mxu1 %v4053_v36 }
  0xe7   :  { %3697 = vmatprep.subr.bf16.mxu1 %v4334_v1 }
  0xea   :  { %3698 = vmatpush3.bf16.msra.mxu1 %v4057_v37 }
  0xeb   :  { %3699 = vmatprep.subr.bf16.mxu1 %v4334_v1 }
  0xee   :  { %3700 = vmatpush3.bf16.msra.mxu1 %v4061_v38 }
  0xef   :  { %3701 = vmatprep.subr.bf16.mxu1 %v4334_v1 }
  0xf2   :  { %3702 = vmatpush3.bf16.msra.mxu1 %v4065_v39 }
  0xf3   :  { %3703 = vmatprep.subr.bf16.mxu1 %v4334_v1 }
  0xf6   :  { %3704 = vmatpush3.bf16.msra.mxu1 %v4069_v40 }
  0xf7   :  { %3705 = vmatprep.subr.bf16.mxu1 %v4334_v1 }
  0xfa   :  { %3706 = vmatpush3.bf16.msra.mxu1 %v4073_v43 }
  0xfb   :  { %3707 = vmatprep.subr.bf16.mxu1 %v4334_v1 }
  0xfe   :  { %3708 = vmatpush3.bf16.msra.mxu1 %v4077_v46  ;;  %v4104_v46 = vld [vmem:[%s5363_s4 + $0x170] ss:$88 sps:$4 sm:$0xff]  }
  0xff   :  { %3737 = vmatprep.subr.bf16.mxu1 %v4334_v1 }
 0x1b4   :  { %v204_v49 = vpop.f32.mrb[0].mxu1 }
 0x1b5   :  { %v205_v50 = vadd.f32 %v3327_v48, %v204_v49  ;;  %v3691_v51 = vpop.f32.mrb[1].mxu1  ;;  %v4106_v49 = vld [vmem:[%s5363_s4 + $0x2d0] ss:$88 sps:$4 sm:$0xff]  }
 0x1b6   :  { %v207_v52 = vpop.f32.mrb[2].mxu1 }
 0x1b7   :  { %v208_v53 = vadd.f32 %v3327_v48, %v207_v52  ;;  %v3692_v54 = vpop.f32.mrb[3].mxu1  ;;  %v211_v55 = vmax.f32 %v205_v50, 0.0  ;;  %v4105_v48 = vld [vmem:[%s5363_s4 + $0x220] ss:$88 sps:$4 sm:$0xff]  }
 0x1b9   :  { %v212_v56 = vmax.f32 %v208_v53, 0.0 }
 0x1bb   :  { %v246_v57 = vpack.c.bf16 %v212_v56, %v211_v55 }
 0x1bd   :  { %424 = vmatmul.mubr.bf16.vlgmr.msra.gmra.mrb[4].mxu0 %v246_v57  ;;  %3710 = vmatmul.mubr.bf16.vlgmr.msra.gmra.mrb[4].mxu1 %v246_v57  ;;  %v4080_v57 = vld [vmem:[%s5363_s4 + $0x18] ss:$88 sps:$4 sm:$0xff]  }
 0x1be   :  { %3715 = vmatprep.mubr.msk.bf16.mxu0 %vm4335_vm1, %v4334_v1  ;;  %3753 = vmatprep.mubr.msk.bf16.mxu1 %vm4335_vm1, %v4334_v1 }
 0x1bf   :  { %3738 = vmatpush3.bf16.msra.mxu1 %v4102_v44 }
 0x1c0   :  { %3739 = vmatprep.subr.bf16.mxu1 %v4334_v1 }
 0x1c3   :  { %3740 = vmatpush3.bf16.msra.mxu1 %v4103_v45 }
 0x1c4   :  { %3741 = vmatprep.subr.bf16.mxu1 %v4334_v1 }
 0x1c7   :  { %3742 = vmatpush3.bf16.msra.mxu1 %v4104_v46 }
 0x1c8   :  { %3743 = vmatprep.subr.bf16.mxu1 %v4334_v1 }
 0x1cb   :  { %3744 = vmatpush3.bf16.msra.mxu1 %v4105_v48 }
 0x1cc   :  { %3745 = vmatprep.subr.bf16.mxu1 %v4334_v1 }
 0x1cf   :  { %3746 = vmatpush3.bf16.msra.mxu1 %v4106_v49  ;;  %v4110_v49 = vld [vmem:[%s5363_s4 + $0x1c] ss:$88 sps:$4 sm:$0xff]  }
 0x1d0   :  { %3747 = vmatprep.subr.bf16.mxu1 %v4334_v1 }
 0x290   :  { %v425_v2 = vpop.f32.mrb[4].mxu0  ;;  %v468_v3 = vpop.f32.mrb[4].mxu1 }
 0x291   :  { %v427_v5 = vpop.f32.mrb[5].mxu0  ;;  %v3711_v6 = vpop.f32.mrb[5].mxu1  ;;  %v426_v15 = vadd.f32 %v425_v2, %v251_v10  ;;  %v469_v19 = vadd.f32 %v468_v3, %v259_v4 }
 0x292   :  { %v428_v7 = vadd.f32 %v427_v5, %v255_v63  ;;  %v429_v8 = vpop.f32.mrb[6].mxu0  ;;  %v471_v9 = vpop.f32.mrb[6].mxu1  ;;  %v4081_v5 = vld [vmem:[%s5363_s4 + $0xc4] ss:$88 sps:$4 sm:$0xff]   ;;  %v4086_v6 = vld [vmem:[%s5363_s4 + $0x178] ss:$88 sps:$4 sm:$0xff]  }
 0x293   :  { %v4541_v11 = vadd.f32 %v471_v9, %v259_v4  ;;  %v431_v12 = vpop.f32.mrb[7].mxu0  ;;  %v3712_v13 = vpop.f32.mrb[7].mxu1  ;;  %v475_v17 = vpack.c.bf16 %v426_v15, %v426_v15  ;;  %v430_v20 = vadd.f32 %v429_v8, %v251_v10  ;;  %v479_v21 = vpack.c.bf16 %v469_v19, %v469_v19  ;;  %v4083_v4 = vld [vmem:[%s5363_s4 + $0xc8] ss:$88 sps:$4 sm:$0xff]   ;;  %v4087_v9 = vld [vmem:[%s5363_s4 + $0x224] ss:$88 sps:$4 sm:$0xff]  }
 0x294   :  { %v477_v14 = vpack.c.bf16 %v428_v7, %v428_v7  ;;  %v432_v16 = vadd.f32 %v431_v12, %v255_v63  ;;  %v4078_v63 = vld [vmem:[%s5363_s4 + $0x14] ss:$88 sps:$4 sm:$0xff]   ;;  %v4089_v8 = vld [vmem:[%s5363_s4 + $0x228] ss:$88 sps:$4 sm:$0xff]   ;;  %v4092_v10 = vld [vmem:[%s5363_s4 + $0x2d8] ss:$88 sps:$4 sm:$0xff]  }
 0x295   :  { %v476_v22 = vpack.c.bf16 %v430_v20, %v430_v20  ;;  %v591_v23 = vsel %vm589_vm2, %v479_v21, 0  ;;  %v480_v53 = vpack.c.bf16 %v4541_v11, %v4541_v11  ;;  %v4084_v7 = vld [vmem:[%s5363_s4 + $0x174] ss:$88 sps:$4 sm:$0xff]   ;;  %v4095_v12 = vld [vmem:[%s5363_s4 + $0x388] ss:$88 sps:$4 sm:$0xff]  }
 0x296   :  { %3714 = vmatpush3.bf16.xpose.msra.mxu0 %v477_v14  ;;  %v478_v18 = vpack.c.bf16 %v432_v16, %v432_v16  ;;  %v4090_v11 = vld [vmem:[%s5363_s4 + $0x2d4] ss:$88 sps:$4 sm:$0xff]   ;;  %v4093_v13 = vld [vmem:[%s5363_s4 + $0x384] ss:$88 sps:$4 sm:$0xff]   ;;  %v4098_v14 = vld [vmem:[%s5363_s4 + $0x438] ss:$88 sps:$4 sm:$0xff]  }
 0x297   :  { %3719 = vmatprep.subr.bf16.mxu0 %v4334_v1  ;;  %v637_v58 = vsel %vm589_vm2, %v480_v53, 0  ;;  %v4096_v15 = vld [vmem:[%s5363_s4 + $0x434] ss:$88 sps:$4 sm:$0xff]   ;;  %v4101_v16 = vld [vmem:[%s5363_s4 + $0x4e8] ss:$88 sps:$4 sm:$0xff]  }
 0x298   :  { %v793_v19 = vld [vmem:[%s5360_s1 + $0x8] sm:$0xff]  ;;  %v4107_v21 = vld [vmem:[%s5363_s4 + $0x380] ss:$88 sps:$4 sm:$0xff]   ;;  %v4114_v53 = vld [vmem:[%s5363_s4 + $0x2dc] ss:$88 sps:$4 sm:$0xff]  }
 0x299   :  { %3748 = vmatpush3.bf16.msra.mxu1 %v4107_v21 }
 0x29a   :  { %3749 = vmatprep.subr.bf16.mxu1 %v4334_v1 }
 0x29d   :  { %3716 = vmatmul.mubr.bf16.vlgmr.msra.gmra.mrb[8].mxu0 %v475_v17  ;;  %v4099_v17 = vld [vmem:[%s5363_s4 + $0x4e4] ss:$88 sps:$4 sm:$0xff]  }
 0x29e   :  { %3720 = vmatpush3.bf16.xpose.msra.mxu0 %v478_v18  ;;  %3721 = vmatprep.mubr.msk.bf16.mxu0 %vm4335_vm1, %v4334_v1  ;;  %v792_v18 = vld [vmem:[%s5360_s1] sm:$0xff] }
 0x29f   :  { %3725 = vmatprep.subr.bf16.mxu0 %v4334_v1  ;;  %v4645_v20 = vpack.c.bf16 %v793_v19, %v792_v18 }
 0x2a5   :  { %3722 = vmatmul.mubr.bf16.vlgmr.msra.gmra.mrb[12].mxu0 %v476_v22  ;;  %v4108_v22 = vld [vmem:[%s5363_s4 + $0x430] ss:$88 sps:$4 sm:$0xff]  }
 0x2a6   :  { %3726 = vmatpush3.bf16.msra.mxu0 %v591_v23  ;;  %3727 = vmatprep.mubr.msk.bf16.mxu0 %vm4335_vm1, %v4334_v1  ;;  %v4109_v23 = vld [vmem:[%s5363_s4 + $0x4e0] ss:$88 sps:$4 sm:$0xff]  }
 0x2a7   :  { %3731 = vmatprep.subr.bf16.mxu0 %v4334_v1  ;;  %3750 = vmatpush3.bf16.msra.mxu1 %v4108_v22 }
 0x2a8   :  { %3751 = vmatprep.subr.bf16.mxu1 %v4334_v1 }
 0x2ab   :  { %3752 = vmatpush3.bf16.msra.mxu1 %v4109_v23 }
 0x2ac   :  { %3757 = vmatprep.subr.bf16.mxu1 %v4334_v1 }
 0x370   :  { %v515_v24 = vpop.f32.mrb[8].mxu0 }
 0x371   :  { %v3717_v25 = vpop.f32.mrb[9].mxu0  ;;  %v562_v26 = vsel %vm561_vm3, %v515_v24, -inf }
 0x372   :  { %563 = vmax.xlane.f32.xlu0 %v562_v26  ;;  %v518_v27 = vpop.f32.mrb[10].mxu0 }
 0x373   :  { %v3718_v28 = vpop.f32.mrb[11].mxu0 }
 0x378   :  { %v555_v29 = vpop.f32.mrb[12].mxu0 }
 0x379   :  { %v3723_v30 = vpop.f32.mrb[13].mxu0  ;;  %v565_v31 = vsel %vm561_vm3, %v555_v29, -inf }
 0x37a   :  { %566 = vmax.xlane.f32.xlu0 %v565_v31  ;;  %v558_v32 = vpop.f32.mrb[14].mxu0 }
 0x37b   :  { %v3724_v33 = vpop.f32.mrb[15].mxu0 }
 0x37c   :  { %v4668_v33 = vld [vmem:[%s5364_s5 + $0x5] sm:$0x7] }
 0x3ff   :  { %v564_v34 = vpop.xlane.xlu0 %563 }
 0x400   :  { %v568_v35 = vsub.f32 %v515_v24, %v564_v34  ;;  %v836_v34 = vrot.slane %v4668_v33, %v4529_v60 }
 0x402   :  { %v570_v36 = vmul.f32 1.442695, %v568_v35 }
 0x404   :  { %4270 = vpow2.f32 %v570_v36 }
 0x407   :  { %v567_v37 = vpop.xlane.xlu0 %566 }
 0x408   :  { %v569_v38 = vsub.f32 %v555_v29, %v567_v37 }
 0x40a   :  { %v572_v39 = vmul.f32 1.442695, %v569_v38 }
 0x40c   :  { %4272 = vpow2.f32 %v572_v39  ;;  %v832_v39 = vrot.slane %v4668_v33, %v4537_v0 }
 0x40e   :  { %v4271_v40 = vpop.eup %4270 }
 0x40f   :  { %v574_v41 = vsel %vm561_vm3, %v4271_v40, 0.0 }
 0x410   :  { %575 = vadd.xlane.f32.xlu1 %v574_v41 }
 0x416   :  { %v4273_v42 = vpop.eup %4272 }
 0x417   :  { %v577_v43 = vsel %vm561_vm3, %v4273_v42, 0.0 }
 0x418   :  { %578 = vadd.xlane.f32.xlu1 %v577_v43 }
 0x49d   :  { %v576_v50 = vpop.xlane.xlu1 %575 }
 0x49e   :  { %4274 = vrcp.f32 %v576_v50  ;;  %v4111_v50 = vld [vmem:[%s5363_s4 + $0xcc] ss:$88 sps:$4 sm:$0xff]  }
 0x4a5   :  { %v579_v51 = vpop.xlane.xlu1 %578 }
 0x4a6   :  { %4276 = vrcp.f32 %v579_v51  ;;  %v4112_v51 = vld [vmem:[%s5363_s4 + $0x17c] ss:$88 sps:$4 sm:$0xff]  }
 0x4a8   :  { %v4275_v52 = vpop.eup %4274 }
 0x4a9   :  { %v581_v54 = vmul.f32 %v4275_v52, %v4271_v40  ;;  %v4113_v52 = vld [vmem:[%s5363_s4 + $0x22c] ss:$88 sps:$4 sm:$0xff]  }
 0x4ab   :  { %v3286_v55 = vsel %vm561_vm3, %v581_v54, 0.0  ;;  %v584_v56 = vpack.c.bf16 %v581_v54, %v581_v54  ;;  %v4115_v54 = vld [vmem:[%s5363_s4 + $0x38c] ss:$88 sps:$4 sm:$0xff]  }
 0x4ac   :  { %3296 = vst [vmem:[%s5368_s9] sm:$0xff] %v3286_v55  ;;  %v4116_v55 = vld [vmem:[%s5363_s4 + $0x43c] ss:$88 sps:$4 sm:$0xff]  }
 0x4ad   :  { %3728 = vmatmul.mubr.msk.bf16.vlgmr.msra.gmra.mrb[16].mxu0 %vm561_vm3, %v584_v56  ;;  %v4117_v56 = vld [vmem:[%s5363_s4 + $0x4ec] ss:$88 sps:$4 sm:$0xff]  }
 0x4ae   :  { %3732 = vmatpush3.bf16.msra.mxu0 %v637_v58  ;;  %3733 = vmatprep.mubr.msk.bf16.mxu0 %vm4335_vm1, %v4334_v1 }
 0x4af   :  { %972 = vmatprep.subr.bf16.mxu0 %v4080_v57 }
 0x4b0   :  { %v4277_v59 = vpop.eup %4276 }
 0x4b1   :  { %v583_v61 = vmul.f32 %v4277_v59, %v4273_v42 }
 0x4b3   :  { %v3287_v2 = vsel %vm561_vm3, %v583_v61, 0.0  ;;  %v585_v3 = vpack.c.bf16 %v583_v61, %v583_v61 }
 0x4b4   :  { %3301 = vst [vmem:[%s5368_s9 + $0x28] sm:$0xff] %v3287_v2 }
 0x4b5   :  { %3734 = vmatmul.mubr.msk.bf16.vlgmr.msra.gmra.mrb[20].mxu0 %vm561_vm3, %v585_v3 }
 0x4b6   :  { %973 = vmatpush1.bf16.msra.mxu0 %v4078_v63  ;;  %1004 = vmatprep.mubr.bf16.mxu0 %v4336_v47 }
 0x4b7   :  { %974 = vmatprep.subr.bf16.mxu0 %v4083_v4 }
 0x4ba   :  { %975 = vmatpush1.bf16.msra.mxu0 %v4081_v5 }
 0x4bb   :  { %976 = vmatprep.subr.bf16.mxu0 %v4086_v6 }
 0x4be   :  { %977 = vmatpush1.bf16.msra.mxu0 %v4084_v7 }
 0x4bf   :  { %978 = vmatprep.subr.bf16.mxu0 %v4089_v8 }
 0x4c2   :  { %979 = vmatpush1.bf16.msra.mxu0 %v4087_v9 }
 0x4c3   :  { %980 = vmatprep.subr.bf16.mxu0 %v4092_v10 }
 0x4c6   :  { %981 = vmatpush1.bf16.msra.mxu0 %v4090_v11  ;;  %v840_v11 = vrot.slane %v4668_v33, %v4534_v62  ;;  %v4145_v33 = vld [vmem:[%s5363_s4 + $0x230] ss:$88 sps:$4 sm:$0xff]  }
 0x4c7   :  { %982 = vmatprep.subr.bf16.mxu0 %v4095_v12 }
 0x4ca   :  { %983 = vmatpush1.bf16.msra.mxu0 %v4093_v13 }
 0x4cb   :  { %984 = vmatprep.subr.bf16.mxu0 %v4098_v14 }
 0x4ce   :  { %985 = vmatpush1.bf16.msra.mxu0 %v4096_v15 }
 0x4cf   :  { %986 = vmatprep.subr.bf16.mxu0 %v4101_v16 }
 0x4d2   :  { %987 = vmatpush1.bf16.msra.mxu0 %v4099_v17 }
 0x4d3   :  { %3777 = vmatprep.subr.bf16.mxu0 %v4334_v1 }
 0x4d5   :  { %1005 = vmatmul.mubr.bf16.vlgmr.msra.gmra.mrb[24].mxu0 %v4645_v20 }
 0x4d6   :  { %3779 = vmatprep.mubr.msk.bf16.mxu0 %vm4335_vm1, %v4334_v1 }
 0x580   :  { %v627_v24 = vpop.f32.mrb[16].mxu0 }
 0x581   :  { %v3729_v25 = vpop.f32.mrb[17].mxu0 }
 0x582   :  { %v630_v26 = vpop.f32.mrb[18].mxu0 }
 0x583   :  { %v3730_v27 = vpop.f32.mrb[19].mxu0 }
 0x588   :  { %v673_v28 = vpop.f32.mrb[20].mxu0 }
 0x589   :  { %v696_v29 = vpack.c.bf16 %v673_v28, %v627_v24  ;;  %v3735_v30 = vpop.f32.mrb[21].mxu0 }
 0x58a   :  { %v676_v31 = vpop.f32.mrb[22].mxu0  ;;  %v4142_v30 = vld [vmem:[%s5363_s4 + $0x20] ss:$88 sps:$4 sm:$0xff]  }
 0x58b   :  { %v3736_v32 = vpop.f32.mrb[23].mxu0  ;;  %3754 = vmatmul.mubr.bf16.vlgmr.msra.gmra.mrb[8].mxu1 %v696_v29  ;;  %v4143_v31 = vld [vmem:[%s5363_s4 + $0xd0] ss:$88 sps:$4 sm:$0xff]  }
 0x58c   :  { %3773 = vmatprep.mubr.msk.bf16.mxu1 %vm4335_vm1, %v4334_v1  ;;  %3758 = vmatpush3.bf16.msra.mxu1 %v4110_v49  ;;  %v4144_v32 = vld [vmem:[%s5363_s4 + $0x180] ss:$88 sps:$4 sm:$0xff]  }
 0x58d   :  { %3759 = vmatprep.subr.bf16.mxu1 %v4334_v1 }
 0x590   :  { %3760 = vmatpush3.bf16.msra.mxu1 %v4111_v50 }
 0x591   :  { %3761 = vmatprep.subr.bf16.mxu1 %v4334_v1 }
 0x594   :  { %3762 = vmatpush3.bf16.msra.mxu1 %v4112_v51  ;;  %v4123_v51 = vld [vmem:[%s5363_s4 + $0xd8] ss:$88 sps:$4 sm:$0xff]  }
 0x595   :  { %3763 = vmatprep.subr.bf16.mxu1 %v4334_v1 }
 0x598   :  { %3764 = vmatpush3.bf16.msra.mxu1 %v4113_v52  ;;  %v4121_v52 = vld [vmem:[%s5363_s4 + $0xd4] ss:$88 sps:$4 sm:$0xff]  }
 0x599   :  { %3765 = vmatprep.subr.bf16.mxu1 %v4334_v1 }
 0x59c   :  { %3766 = vmatpush3.bf16.msra.mxu1 %v4114_v53  ;;  %v4126_v53 = vld [vmem:[%s5363_s4 + $0x188] ss:$88 sps:$4 sm:$0xff]  }
 0x59d   :  { %3767 = vmatprep.subr.bf16.mxu1 %v4334_v1 }
 0x5a0   :  { %3768 = vmatpush3.bf16.msra.mxu1 %v4115_v54  ;;  %v4124_v54 = vld [vmem:[%s5363_s4 + $0x184] ss:$88 sps:$4 sm:$0xff]  }
 0x5a1   :  { %3769 = vmatprep.subr.bf16.mxu1 %v4334_v1 }
 0x5a4   :  { %3770 = vmatpush3.bf16.msra.mxu1 %v4116_v55  ;;  %v4129_v55 = vld [vmem:[%s5363_s4 + $0x238] ss:$88 sps:$4 sm:$0xff]  }
 0x5a5   :  { %3771 = vmatprep.subr.bf16.mxu1 %v4334_v1 }
 0x5a8   :  { %v1006_v35 = vpop.f32.mrb[24].mxu0  ;;  %3772 = vmatpush3.bf16.msra.mxu1 %v4117_v56  ;;  %v4127_v56 = vld [vmem:[%s5363_s4 + $0x234] ss:$88 sps:$4 sm:$0xff]  }
 0x5a9   :  { %v1008_v36 = vpop.f32.mrb[25].mxu0  ;;  %v1007_v42 = vadd.f32 %v1006_v35, %v832_v39  ;;  %3801 = vmatprep.subr.bf16.mxu1 %v4334_v1  ;;  %v4147_v35 = vld [vmem:[%s5363_s4 + $0x390] ss:$88 sps:$4 sm:$0xff]  }
 0x5aa   :  { %v1009_v37 = vadd.f32 %v1008_v36, %v836_v34  ;;  %v1010_v38 = vpop.f32.mrb[26].mxu0 }
 0x5ab   :  { %v1012_v40 = vpop.f32.mrb[27].mxu0  ;;  %v1056_v44 = vpack.c.bf16 %v1007_v42, %v1007_v42  ;;  %v1011_v46 = vadd.f32 %v1010_v38, %v832_v39  ;;  %3774 = vmatmul.mubr.bf16.vlgmr.msra.gmra.mrb[12].mxu1 %v4645_v20 }
 0x5ac   :  { %v1058_v41 = vpack.c.bf16 %v1009_v37, %v1009_v37  ;;  %v1013_v43 = vadd.f32 %v1012_v40, %v836_v34  ;;  %3817 = vmatprep.mubr.msk.bf16.mxu1 %vm4335_vm1, %v4334_v1  ;;  %3802 = vmatpush3.bf16.msra.mxu1 %v4142_v30  ;;  %v4146_v34 = vld [vmem:[%s5363_s4 + $0x2e0] ss:$88 sps:$4 sm:$0xff]   ;;  %v4150_v30 = vld [vmem:[%s5363_s4 + $0x2c] ss:$88 sps:$4 sm:$0xff]  }
 0x5ad   :  { %v1057_v48 = vpack.c.bf16 %v1011_v46, %v1011_v46  ;;  %3803 = vmatprep.subr.bf16.mxu1 %v4334_v1 }
 0x5ae   :  { %3778 = vmatpush3.bf16.xpose.msra.mxu0 %v1058_v41  ;;  %v1059_v45 = vpack.c.bf16 %v1013_v43, %v1013_v43  ;;  %v4120_v43 = vld [vmem:[%s5363_s4 + $0x28] ss:$88 sps:$4 sm:$0xff]  }
 0x5af   :  { %3783 = vmatprep.subr.bf16.mxu0 %v4334_v1 }
 0x5b0   :  { %3804 = vmatpush3.bf16.msra.mxu1 %v4143_v31 }
 0x5b1   :  { %3805 = vmatprep.subr.bf16.mxu1 %v4334_v1 }
 0x5b4   :  { %3806 = vmatpush3.bf16.msra.mxu1 %v4144_v32 }
 0x5b5   :  { %3780 = vmatmul.mubr.bf16.vlgmr.msra.gmra.mrb[28].mxu0 %v1056_v44  ;;  %3807 = vmatprep.subr.bf16.mxu1 %v4334_v1 }
 0x5b6   :  { %3784 = vmatpush3.bf16.xpose.msra.mxu0 %v1059_v45  ;;  %3785 = vmatprep.mubr.msk.bf16.mxu0 %vm4335_vm1, %v4334_v1 }
 0x5b7   :  { %3789 = vmatprep.subr.bf16.mxu0 %v4334_v1 }
 0x5b8   :  { %3808 = vmatpush3.bf16.msra.mxu1 %v4145_v33 }
 0x5b9   :  { %3809 = vmatprep.subr.bf16.mxu1 %v4334_v1 }
 0x5bc   :  { %3810 = vmatpush3.bf16.msra.mxu1 %v4146_v34 }
 0x5bd   :  { %3786 = vmatmul.mubr.bf16.vlgmr.msra.gmra.mrb[32].mxu0 %v1057_v48  ;;  %3811 = vmatprep.subr.bf16.mxu1 %v4334_v1  ;;  %v4118_v48 = vld [vmem:[%s5363_s4 + $0x24] ss:$88 sps:$4 sm:$0xff]  }
 0x5be   :  { %3791 = vmatprep.mubr.msk.bf16.mxu0 %vm4335_vm1, %v4334_v1 }
 0x5c0   :  { %3812 = vmatpush3.bf16.msra.mxu1 %v4147_v35  ;;  %v4151_v35 = vld [vmem:[%s5363_s4 + $0xdc] ss:$88 sps:$4 sm:$0xff]  }
 0x5c1   :  { %3813 = vmatprep.subr.bf16.mxu1 %v4334_v1 }
 0x65e   :  { %v4715_v57 = vpop.f32.mrb[8].mxu1 }
 0x65f   :  { %v3755_v58 = vpop.f32.mrb[9].mxu1 }
 0x660   :  { %v4717_v59 = vpop.f32.mrb[10].mxu1  ;;  %v4132_v58 = vld [vmem:[%s5363_s4 + $0x2e8] ss:$88 sps:$4 sm:$0xff]  }
 0x661   :  { %v3756_v61 = vpop.f32.mrb[11].mxu1 }
 0x662   :  { %v4130_v61 = vld [vmem:[%s5363_s4 + $0x2e4] ss:$88 sps:$4 sm:$0xff]  }
 0x67e   :  { %v1049_v12 = vpop.f32.mrb[12].mxu1 }
 0x67f   :  { %v1050_v13 = vadd.f32 %v1049_v12, %v840_v11  ;;  %v3775_v14 = vpop.f32.mrb[13].mxu1  ;;  %v4162_v12 = vld [vmem:[%s5363_s4 + $0x34] ss:$88 sps:$4 sm:$0xff]  }
 0x680   :  { %v1052_v27 = vpop.f32.mrb[14].mxu1  ;;  %v4166_v14 = vld [vmem:[%s5363_s4 + $0xe4] ss:$88 sps:$4 sm:$0xff]  }
 0x681   :  { %v1060_v15 = vpack.c.bf16 %v1050_v13, %v1050_v13  ;;  %v3776_v28 = vpop.f32.mrb[15].mxu1  ;;  %v1053_v29 = vadd.f32 %v1052_v27, %v840_v11  ;;  %v4148_v11 = vld [vmem:[%s5363_s4 + $0x440] ss:$88 sps:$4 sm:$0xff]  }
 0x682   :  { %3814 = vmatpush3.bf16.msra.mxu1 %v4148_v11  ;;  %v4164_v13 = vld [vmem:[%s5363_s4 + $0xe0] ss:$88 sps:$4 sm:$0xff]  }
 0x683   :  { %v1170_v16 = vsel %vm589_vm2, %v1060_v15, 0  ;;  %v1061_v40 = vpack.c.bf16 %v1053_v29, %v1053_v29  ;;  %3815 = vmatprep.subr.bf16.mxu1 %v4334_v1  ;;  %v4168_v15 = vld [vmem:[%s5363_s4 + $0x190] ss:$88 sps:$4 sm:$0xff]  }
 0x684   :  { %3790 = vmatpush3.bf16.msra.mxu0 %v1170_v16  ;;  %v4170_v16 = vld [vmem:[%s5363_s4 + $0x194] ss:$88 sps:$4 sm:$0xff]  }
 0x685   :  { %3795 = vmatprep.subr.bf16.mxu0 %v4334_v1  ;;  %v1216_v44 = vsel %vm589_vm2, %v1061_v40, 0  ;;  %v4156_v40 = vld [vmem:[%s5363_s4 + $0x44c] ss:$88 sps:$4 sm:$0xff]  }
 0x688   :  { %v1096_v63 = vpop.f32.mrb[28].mxu0 }
 0x689   :  { %v3781_v2 = vpop.f32.mrb[29].mxu0  ;;  %v1142_v3 = vsel %vm561_vm3, %v1096_v63, -inf }
 0x68a   :  { %1143 = vmax.xlane.f32.xlu0 %v1142_v3  ;;  %v1099_v4 = vpop.f32.mrb[30].mxu0  ;;  %v4133_v2 = vld [vmem:[%s5363_s4 + $0x394] ss:$88 sps:$4 sm:$0xff]   ;;  %v4138_v3 = vld [vmem:[%s5363_s4 + $0x448] ss:$88 sps:$4 sm:$0xff]  }
 0x68b   :  { %v3782_v5 = vpop.f32.mrb[31].mxu0  ;;  %v4136_v4 = vld [vmem:[%s5363_s4 + $0x444] ss:$88 sps:$4 sm:$0xff]  }
 0x68c   :  { %v4141_v5 = vld [vmem:[%s5363_s4 + $0x4f8] ss:$88 sps:$4 sm:$0xff]  }
 0x690   :  { %v1136_v6 = vpop.f32.mrb[32].mxu0 }
 0x691   :  { %v3787_v7 = vpop.f32.mrb[33].mxu0  ;;  %v1145_v8 = vsel %vm561_vm3, %v1136_v6, -inf }
 0x692   :  { %1146 = vmax.xlane.f32.xlu1 %v1145_v8  ;;  %v1139_v9 = vpop.f32.mrb[34].mxu0  ;;  %v4139_v7 = vld [vmem:[%s5363_s4 + $0x4f4] ss:$88 sps:$4 sm:$0xff]  }
 0x693   :  { %v3788_v10 = vpop.f32.mrb[35].mxu0 }
 0x717   :  { %v1144_v17 = vpop.xlane.xlu0 %1143 }
 0x718   :  { %v1148_v18 = vsub.f32 %v1096_v63, %v1144_v17  ;;  %v4135_v63 = vld [vmem:[%s5363_s4 + $0x398] ss:$88 sps:$4 sm:$0xff]  }
 0x719   :  { %v4172_v17 = vld [vmem:[%s5363_s4 + $0x240] ss:$88 sps:$4 sm:$0xff]  }
 0x71a   :  { %v1150_v19 = vmul.f32 1.442695, %v1148_v18  ;;  %v4174_v18 = vld [vmem:[%s5363_s4 + $0x244] ss:$88 sps:$4 sm:$0xff]  }
 0x71c   :  { %4278 = vpow2.f32 %v1150_v19  ;;  %v4176_v19 = vld [vmem:[%s5363_s4 + $0x2f0] ss:$88 sps:$4 sm:$0xff]  }
 0x71f   :  { %v1147_v20 = vpop.xlane.xlu1 %1146 }
 0x720   :  { %v1149_v21 = vsub.f32 %v1136_v6, %v1147_v20  ;;  %v3362_v6 = vld [vmem:[%s5364_s5 + $0x4] ss:$0 sm:$0xff]  ;;  %v4178_v20 = vld [vmem:[%s5363_s4 + $0x2f4] ss:$88 sps:$4 sm:$0xff]  }
 0x721   :  { %v4817_v8 = vadd.f32 %v3362_v6, %v4717_v59  ;;  %v4820_v9 = vadd.f32 %v3362_v6, %v4715_v57  ;;  %v4149_v59 = vld [vmem:[%s5363_s4 + $0x4f0] ss:$88 sps:$4 sm:$0xff]  }
 0x722   :  { %v1152_v22 = vmul.f32 1.442695, %v1149_v21  ;;  %3816 = vmatpush3.bf16.msra.mxu1 %v4149_v59  ;;  %v4160_v57 = vld [vmem:[%s5363_s4 + $0x30] ss:$88 sps:$4 sm:$0xff]   ;;  %v4180_v21 = vld [vmem:[%s5363_s4 + $0x3a0] ss:$88 sps:$4 sm:$0xff]  }
 0x723   :  { %v4824_v10 = vpack.c.bf16 %v4817_v8, %v4820_v9  ;;  %3821 = vmatprep.subr.bf16.mxu1 %v4334_v1 }
 0x724   :  { %4280 = vpow2.f32 %v1152_v22  ;;  %v4182_v22 = vld [vmem:[%s5363_s4 + $0x3a4] ss:$88 sps:$4 sm:$0xff]  }
 0x726   :  { %v4279_v23 = vpop.eup %4278 }
 0x727   :  { %v1154_v24 = vsel %vm561_vm3, %v4279_v23, 0.0 }
 0x728   :  { %1155 = vadd.xlane.f32.xlu0 %v1154_v24  ;;  %v4186_v24 = vld [vmem:[%s5363_s4 + $0x454] ss:$88 sps:$4 sm:$0xff]  }
 0x72e   :  { %v4281_v25 = vpop.eup %4280 }
 0x72f   :  { %v1157_v26 = vsel %vm561_vm3, %v4281_v25, 0.0 }
 0x730   :  { %1158 = vadd.xlane.f32.xlu1 %v1157_v26 }
 0x7b5   :  { %v1156_v36 = vpop.xlane.xlu0 %1155 }
 0x7b6   :  { %4282 = vrcp.f32 %v1156_v36  ;;  %v4152_v36 = vld [vmem:[%s5363_s4 + $0x18c] ss:$88 sps:$4 sm:$0xff]  }
 0x7bd   :  { %v1159_v37 = vpop.xlane.xlu1 %1158 }
 0x7be   :  { %4284 = vrcp.f32 %v1159_v37  ;;  %v4153_v37 = vld [vmem:[%s5363_s4 + $0x23c] ss:$88 sps:$4 sm:$0xff]  }
 0x7c0   :  { %v4283_v38 = vpop.eup %4282 }
 0x7c1   :  { %v1161_v39 = vmul.f32 %v4283_v38, %v4279_v23  ;;  %v4184_v23 = vld [vmem:[%s5363_s4 + $0x450] ss:$88 sps:$4 sm:$0xff]   ;;  %v4154_v38 = vld [vmem:[%s5363_s4 + $0x2ec] ss:$88 sps:$4 sm:$0xff]  }
 0x7c3   :  { %v3288_v41 = vsel %vm561_vm3, %v1161_v39, 0.0  ;;  %v1164_v42 = vpack.c.bf16 %v1161_v39, %v1161_v39  ;;  %v4155_v39 = vld [vmem:[%s5363_s4 + $0x39c] ss:$88 sps:$4 sm:$0xff]  }
 0x7c4   :  { %3297 = vst [vmem:[%s5368_s9 + $0x8] sm:$0xff] %v3288_v41  ;;  %v4157_v41 = vld [vmem:[%s5363_s4 + $0x4fc] ss:$88 sps:$4 sm:$0xff]  }
 0x7c5   :  { %3792 = vmatmul.mubr.msk.bf16.vlgmr.msra.gmra.mrb[36].mxu0 %vm561_vm3, %v1164_v42  ;;  %v4914_v42 = vld [vmem:[%s5364_s5 + $0x9] sm:$0x7] }
 0x7c6   :  { %3796 = vmatpush3.bf16.msra.mxu0 %v1216_v44  ;;  %3797 = vmatprep.mubr.msk.bf16.mxu0 %vm4335_vm1, %v4334_v1  ;;  %v4158_v44 = vld [vmem:[%s5363_s4 + $0x38] ss:$88 sps:$4 sm:$0xff]  }
 0x7c7   :  { %1549 = vmatprep.subr.bf16.mxu0 %v4120_v43 }
 0x7c8   :  { %v4285_v45 = vpop.eup %4284 }
 0x7c9   :  { %v1163_v46 = vmul.f32 %v4285_v45, %v4281_v25 }
 0x7cb   :  { %v3289_v49 = vsel %vm561_vm3, %v1163_v46, 0.0  ;;  %v1165_v50 = vpack.c.bf16 %v1163_v46, %v1163_v46  ;;  %v1413_v46 = vrot.slane %v4914_v42, %v4529_v60 }
 0x7cc   :  { %3302 = vst [vmem:[%s5368_s9 + $0x30] sm:$0xff] %v3289_v49 }
 0x7cd   :  { %3798 = vmatmul.mubr.msk.bf16.vlgmr.msra.gmra.mrb[40].mxu0 %vm561_vm3, %v1165_v50 }
 0x7ce   :  { %1550 = vmatpush1.bf16.msra.mxu0 %v4118_v48  ;;  %1581 = vmatprep.mubr.bf16.mxu0 %v4336_v47 }
 0x7cf   :  { %1551 = vmatprep.subr.bf16.mxu0 %v4123_v51  ;;  %v4159_v51 = vld [vmem:[%s5363_s4 + $0xe8] ss:$88 sps:$4 sm:$0xff]  }
 0x7d2   :  { %1552 = vmatpush1.bf16.msra.mxu0 %v4121_v52  ;;  %v4163_v52 = vld [vmem:[%s5363_s4 + $0x198] ss:$88 sps:$4 sm:$0xff]  }
 0x7d3   :  { %1553 = vmatprep.subr.bf16.mxu0 %v4126_v53  ;;  %v4167_v53 = vld [vmem:[%s5363_s4 + $0x248] ss:$88 sps:$4 sm:$0xff]  }
 0x7d6   :  { %1554 = vmatpush1.bf16.msra.mxu0 %v4124_v54  ;;  %v4171_v54 = vld [vmem:[%s5363_s4 + $0x2f8] ss:$88 sps:$4 sm:$0xff]  }
 0x7d7   :  { %1555 = vmatprep.subr.bf16.mxu0 %v4129_v55  ;;  %v4175_v55 = vld [vmem:[%s5363_s4 + $0x3a8] ss:$88 sps:$4 sm:$0xff]  }
 0x7da   :  { %1556 = vmatpush1.bf16.msra.mxu0 %v4127_v56  ;;  %v4179_v56 = vld [vmem:[%s5363_s4 + $0x458] ss:$88 sps:$4 sm:$0xff]  }
 0x7db   :  { %1557 = vmatprep.subr.bf16.mxu0 %v4132_v58  ;;  %v4183_v58 = vld [vmem:[%s5363_s4 + $0x508] ss:$88 sps:$4 sm:$0xff]  }
 0x7de   :  { %1558 = vmatpush1.bf16.msra.mxu0 %v4130_v61  ;;  %v4189_v61 = vld [vmem:[%s5363_s4 + $0x504] ss:$88 sps:$4 sm:$0xff]  }
 0x7df   :  { %1559 = vmatprep.subr.bf16.mxu0 %v4135_v63  ;;  %v4187_v63 = vld [vmem:[%s5363_s4 + $0x500] ss:$88 sps:$4 sm:$0xff]  }
 0x7e2   :  { %1560 = vmatpush1.bf16.msra.mxu0 %v4133_v2  ;;  %v3397_v2 = vld [vmem:[%s5364_s5 + $0x8] ss:$0 sm:$0xff] }
 0x7e3   :  { %1561 = vmatprep.subr.bf16.mxu0 %v4138_v3 }
 0x7e6   :  { %1562 = vmatpush1.bf16.msra.mxu0 %v4136_v4 }
 0x7e7   :  { %1563 = vmatprep.subr.bf16.mxu0 %v4141_v5 }
 0x7ea   :  { %1564 = vmatpush1.bf16.msra.mxu0 %v4139_v7 }
 0x7eb   :  { %1811 = vmatprep.subr.bf16.mxu0 %v4162_v12 }
 0x7ed   :  { %1582 = vmatmul.mubr.bf16.vlgmr.msra.gmra.mrb[44].mxu0 %v4824_v10 }
 0x7ee   :  { %1843 = vmatprep.mubr.bf16.mxu0 %v4336_v47  ;;  %1812 = vmatpush1.bf16.msra.mxu0 %v4160_v57 }
 0x7ef   :  { %1813 = vmatprep.subr.bf16.mxu0 %v4166_v14 }
 0x7f2   :  { %1814 = vmatpush1.bf16.msra.mxu0 %v4164_v13  ;;  %v1417_v13 = vrot.slane %v4914_v42, %v4534_v62 }
 0x7f3   :  { %1815 = vmatprep.subr.bf16.mxu0 %v4170_v16 }
 0x7f6   :  { %1816 = vmatpush1.bf16.msra.mxu0 %v4168_v15 }
 0x7f7   :  { %1817 = vmatprep.subr.bf16.mxu0 %v4174_v18  ;;  %v1665_v18 = vld [vmem:[%s5364_s5 + $0xc] sm:$0x7] }
 0x7fa   :  { %1818 = vmatpush1.bf16.msra.mxu0 %v4172_v17 }
 0x7fb   :  { %1819 = vmatprep.subr.bf16.mxu0 %v4178_v20  ;;  %v1671_v20 = vrot.slane %v1665_v18, %v4537_v0 }
 0x7fe   :  { %1820 = vmatpush1.bf16.msra.mxu0 %v4176_v19 }
 0x7ff   :  { %1821 = vmatprep.subr.bf16.mxu0 %v4182_v22 }
 0x802   :  { %1822 = vmatpush1.bf16.msra.mxu0 %v4180_v21  ;;  %v1675_v21 = vrot.slane %v1665_v18, %v4529_v60 }
 0x803   :  { %1823 = vmatprep.subr.bf16.mxu0 %v4186_v24 }
 0x806   :  { %1824 = vmatpush1.bf16.msra.mxu0 %v4184_v23 }
 0x807   :  { %1825 = vmatprep.subr.bf16.mxu0 %v4189_v61 }
 0x80a   :  { %1826 = vmatpush1.bf16.msra.mxu0 %v4187_v63 }
 0x80b   :  { %3861 = vmatprep.subr.bf16.mxu0 %v4334_v1 }
 0x898   :  { %v1206_v25 = vpop.f32.mrb[36].mxu0 }
 0x899   :  { %v3793_v26 = vpop.f32.mrb[37].mxu0 }
 0x89a   :  { %v1209_v27 = vpop.f32.mrb[38].mxu0  ;;  %v1679_v26 = vrot.slane %v1665_v18, %v4534_v62 }
 0x89b   :  { %v3794_v28 = vpop.f32.mrb[39].mxu0 }
 0x8a0   :  { %v1252_v29 = vpop.f32.mrb[40].mxu0 }
 0x8a1   :  { %v1275_v31 = vpack.c.bf16 %v1252_v29, %v1206_v25  ;;  %v3799_v32 = vpop.f32.mrb[41].mxu0 }
 0x8a2   :  { %v1255_v33 = vpop.f32.mrb[42].mxu0  ;;  %v1409_v32 = vrot.slane %v4914_v42, %v4537_v0 }
 0x8a3   :  { %v3800_v34 = vpop.f32.mrb[43].mxu0  ;;  %3818 = vmatmul.mubr.bf16.vlgmr.msra.gmra.mrb[16].mxu1 %v1275_v31 }
 0x8a4   :  { %3822 = vmatpush3.bf16.msra.mxu1 %v4150_v30  ;;  %3837 = vmatprep.mubr.msk.bf16.mxu1 %vm4335_vm1, %v4334_v1 }
 0x8a5   :  { %3823 = vmatprep.subr.bf16.mxu1 %v4334_v1 }
 0x8a8   :  { %3824 = vmatpush3.bf16.msra.mxu1 %v4151_v35 }
 0x8a9   :  { %3825 = vmatprep.subr.bf16.mxu1 %v4334_v1 }
 0x8ac   :  { %3826 = vmatpush3.bf16.msra.mxu1 %v4152_v36 }
 0x8ad   :  { %3827 = vmatprep.subr.bf16.mxu1 %v4334_v1 }
 0x8b0   :  { %3828 = vmatpush3.bf16.msra.mxu1 %v4153_v37 }
 0x8b1   :  { %3829 = vmatprep.subr.bf16.mxu1 %v4334_v1 }
 0x8b4   :  { %3830 = vmatpush3.bf16.msra.mxu1 %v4154_v38 }
 0x8b5   :  { %3831 = vmatprep.subr.bf16.mxu1 %v4334_v1 }
 0x8b8   :  { %3832 = vmatpush3.bf16.msra.mxu1 %v4155_v39 }
 0x8b9   :  { %3833 = vmatprep.subr.bf16.mxu1 %v4334_v1 }
 0x8bc   :  { %3834 = vmatpush3.bf16.msra.mxu1 %v4156_v40 }
 0x8bd   :  { %3835 = vmatprep.subr.bf16.mxu1 %v4334_v1 }
 0x8c0   :  { %v4916_v43 = vpop.f32.mrb[44].mxu0  ;;  %3836 = vmatpush3.bf16.msra.mxu1 %v4157_v41 }
 0x8c1   :  { %v1585_v45 = vpop.f32.mrb[45].mxu0  ;;  %3841 = vmatprep.subr.bf16.mxu1 %v4334_v1  ;;  %v1584_v40 = vadd.f32 %v4916_v43, %v1409_v32 }
 0x8c2   :  { %v4924_v48 = vpop.f32.mrb[46].mxu0  ;;  %v1586_v5 = vadd.f32 %v1585_v45, %v1413_v46 }
 0x8c3   :  { %v1589_v49 = vpop.f32.mrb[47].mxu0  ;;  %3838 = vmatmul.mubr.bf16.vlgmr.msra.gmra.mrb[20].mxu1 %v4824_v10  ;;  %v1895_v42 = vpack.c.bf16 %v1584_v40, %v1584_v40 }
 0x8c4   :  { %v4927_v50 = vadd.f32 %v1589_v49, %v1413_v46  ;;  %3842 = vmatpush3.bf16.msra.mxu1 %v4158_v44  ;;  %3857 = vmatprep.mubr.msk.bf16.mxu1 %vm4335_vm1, %v4334_v1  ;;  %v2099_v57 = vpack.c.bf16 %v1586_v5, %v1586_v5  ;;  %v1588_v46 = vadd.f32 %v4924_v48, %v1409_v32 }
 0x8c5   :  { %3843 = vmatprep.subr.bf16.mxu1 %v4334_v1 }
 0x8c6   :  { %v1896_v43 = vpack.c.bf16 %v1588_v46, %v1588_v46 }
 0x8c8   :  { %3844 = vmatpush3.bf16.msra.mxu1 %v4159_v51 }
 0x8c9   :  { %3845 = vmatprep.subr.bf16.mxu1 %v4334_v1 }
 0x8cc   :  { %3846 = vmatpush3.bf16.msra.mxu1 %v4163_v52 }
 0x8cd   :  { %3847 = vmatprep.subr.bf16.mxu1 %v4334_v1 }
 0x8d0   :  { %3848 = vmatpush3.bf16.msra.mxu1 %v4167_v53 }
 0x8d1   :  { %3849 = vmatprep.subr.bf16.mxu1 %v4334_v1 }
 0x8d4   :  { %3850 = vmatpush3.bf16.msra.mxu1 %v4171_v54 }
 0x8d5   :  { %3851 = vmatprep.subr.bf16.mxu1 %v4334_v1 }
 0x8d8   :  { %3852 = vmatpush3.bf16.msra.mxu1 %v4175_v55 }
 0x8d9   :  { %3853 = vmatprep.subr.bf16.mxu1 %v4334_v1 }
 0x8dc   :  { %3854 = vmatpush3.bf16.msra.mxu1 %v4179_v56 }
 0x8dd   :  { %3855 = vmatprep.subr.bf16.mxu1 %v4334_v1 }
 0x8e0   :  { %3856 = vmatpush3.bf16.msra.mxu1 %v4183_v58 }
 0x8e1   :  { %3885 = vmatprep.subr.bf16.mxu1 %v4334_v1 }
 0x976   :  { %v1364_v3 = vpop.f32.mrb[16].mxu1 }
 0x977   :  { %v3819_v4 = vpop.f32.mrb[17].mxu1  ;;  %v4970_v7 = vadd.f32 %v3397_v2, %v1364_v3 }
 0x978   :  { %v1367_v6 = vpop.f32.mrb[18].mxu1 }
 0x979   :  { %v4972_v10 = vadd.f32 %v3397_v2, %v1367_v6  ;;  %v3820_v11 = vpop.f32.mrb[19].mxu1 }
 0x97b   :  { %v1666_v59 = vpack.c.bf16 %v4972_v10, %v4970_v7 }
 0x97d   :  { %1844 = vmatmul.mubr.bf16.vlgmr.msra.gmra.mrb[48].mxu0 %v1666_v59  ;;  %3858 = vmatmul.mubr.bf16.vlgmr.msra.gmra.mrb[24].mxu1 %v1666_v59 }
 0x97e   :  { %3886 = vmatpush3.bf16.xpose.msra.mxu1 %v2099_v57  ;;  %3887 = vmatprep.mubr.msk.bf16.mxu1 %vm4335_vm1, %v4334_v1 }
 0x97f   :  { %3897 = vmatprep.subr.bf16.mxu1 %v4334_v1  ;;  %3863 = vmatprep.mubr.msk.bf16.mxu0 %vm4335_vm1, %v4334_v1 }
 0x996   :  { %v1626_v12 = vpop.f32.mrb[20].mxu1 }
 0x997   :  { %v3839_v14 = vpop.f32.mrb[21].mxu1  ;;  %v1627_v19 = vadd.f32 %v1626_v12, %v1417_v13 }
 0x998   :  { %v1629_v15 = vpop.f32.mrb[22].mxu1 }
 0x999   :  { %v4983_v16 = vadd.f32 %v1629_v15, %v1417_v13  ;;  %v3840_v17 = vpop.f32.mrb[23].mxu1  ;;  %v2101_v24 = vpack.c.bf16 %v1627_v19, %v1627_v19 }
 0x99b   :  { %v2211_v39 = vsel %vm589_vm2, %v2101_v24, 0  ;;  %v2102_v40 = vpack.c.bf16 %v4983_v16, %v4983_v16 }
 0xa50   :  { %v1845_v22 = vpop.f32.mrb[48].mxu0  ;;  %v1888_v23 = vpop.f32.mrb[24].mxu1 }
 0xa51   :  { %v1846_v25 = vadd.f32 %v1845_v22, %v1671_v20  ;;  %v1847_v27 = vpop.f32.mrb[49].mxu0  ;;  %v3859_v28 = vpop.f32.mrb[25].mxu1  ;;  %v1889_v45 = vadd.f32 %v1888_v23, %v1679_v26 }
 0xa52   :  { %v1848_v29 = vadd.f32 %v1847_v27, %v1675_v21  ;;  %v1849_v30 = vpop.f32.mrb[50].mxu0  ;;  %v1891_v31 = vpop.f32.mrb[26].mxu1 }
 0xa53   :  { %v2097_v33 = vpack.c.bf16 %v1846_v25, %v1846_v25  ;;  %v4993_v34 = vadd.f32 %v1849_v30, %v1671_v20  ;;  %v4995_v35 = vadd.f32 %v1891_v31, %v1679_v26  ;;  %v1851_v36 = vpop.f32.mrb[51].mxu0  ;;  %v3860_v37 = vpop.f32.mrb[27].mxu1  ;;  %v1899_v49 = vpack.c.bf16 %v1889_v45, %v1889_v45 }
 0xa54   :  { %v1897_v38 = vpack.c.bf16 %v1848_v29, %v1848_v29  ;;  %v1852_v41 = vadd.f32 %v1851_v36, %v1675_v21 }
 0xa55   :  { %3888 = vmatmul.mubr.bf16.vlgmr.msra.gmra.mrb[28].mxu1 %v2097_v33  ;;  %v2009_v51 = vsel %vm589_vm2, %v1899_v49, 0  ;;  %v1900_v27 = vpack.c.bf16 %v4995_v35, %v4995_v35 }
 0xa56   :  { %3898 = vmatpush3.bf16.msra.mxu1 %v2211_v39  ;;  %3862 = vmatpush3.bf16.xpose.msra.mxu0 %v1897_v38  ;;  %v1898_v44 = vpack.c.bf16 %v1852_v41, %v1852_v41  ;;  %v2100_v39 = vpack.c.bf16 %v4927_v50, %v4927_v50  ;;  %v2098_v41 = vpack.c.bf16 %v4993_v34, %v4993_v34  ;;  %v2257_v50 = vsel %vm589_vm2, %v2102_v40, 0  ;;  %v4190_v34 = vld [vmem:[%s5363_s4 + $0x3c] ss:$88 sps:$4 sm:$0xff]   ;;  %v4238_v40 = vld [vmem:[%s5363_s4 + $0x308] ss:$88 sps:$4 sm:$0xff]  }
 0xa57   :  { %3867 = vmatprep.subr.bf16.mxu0 %v4334_v1  ;;  %3899 = vmatprep.mubr.msk.bf16.mxu1 %vm4335_vm1, %v4334_v1  ;;  %v2055_v31 = vsel %vm589_vm2, %v1900_v27, 0 }
 0xa5d   :  { %3864 = vmatmul.mubr.bf16.vlgmr.msra.gmra.mrb[52].mxu0 %v1895_v42  ;;  %v4192_v42 = vld [vmem:[%s5363_s4 + $0x40] ss:$88 sps:$4 sm:$0xff]  }
 0xa5e   :  { %3868 = vmatpush3.bf16.xpose.msra.mxu0 %v1898_v44  ;;  %3869 = vmatprep.mubr.msk.bf16.mxu0 %vm4335_vm1, %v4334_v1 }
 0xa5f   :  { %3873 = vmatprep.subr.bf16.mxu0 %v4334_v1  ;;  %2481 = vmatprep.subr.bf16.mxu1 %v4192_v42  ;;  %v4248_v42 = vld [vmem:[%s5363_s4 + $0x46c] ss:$88 sps:$4 sm:$0xff]  }
 0xa65   :  { %3870 = vmatmul.mubr.bf16.vlgmr.msra.gmra.mrb[56].mxu0 %v1896_v43  ;;  %v4195_v43 = vld [vmem:[%s5363_s4 + $0xf0] ss:$88 sps:$4 sm:$0xff]  }
 0xa66   :  { %3874 = vmatpush3.bf16.msra.mxu0 %v2009_v51  ;;  %3875 = vmatprep.mubr.msk.bf16.mxu0 %vm4335_vm1, %v4334_v1  ;;  %v4193_v51 = vld [vmem:[%s5363_s4 + $0xec] ss:$88 sps:$4 sm:$0xff]  }
 0xa67   :  { %3879 = vmatprep.subr.bf16.mxu0 %v4334_v1 }
 0xb28   :  { %v2137_v52 = vpop.f32.mrb[28].mxu1 }
 0xb29   :  { %v3889_v53 = vpop.f32.mrb[29].mxu1  ;;  %v2183_v18 = vsel %vm561_vm3, %v2137_v52, -inf }
 0xb2a   :  { %v2140_v54 = vpop.f32.mrb[30].mxu1  ;;  %v4196_v53 = vld [vmem:[%s5363_s4 + $0x19c] ss:$88 sps:$4 sm:$0xff]  }
 0xb2b   :  { %v3890_v55 = vpop.f32.mrb[31].mxu1  ;;  %v4201_v54 = vld [vmem:[%s5363_s4 + $0x250] ss:$88 sps:$4 sm:$0xff]  }
 0xb2c   :  { %v4199_v55 = vld [vmem:[%s5363_s4 + $0x24c] ss:$88 sps:$4 sm:$0xff]  }
 0xb30   :  { %v1935_v56 = vpop.f32.mrb[52].mxu0 }
 0xb31   :  { %v3865_v58 = vpop.f32.mrb[53].mxu0  ;;  %v1981_v48 = vsel %vm561_vm3, %v1935_v56, -inf }
 0xb32   :  { %1982 = vmax.xlane.f32.xlu0 %v1981_v48  ;;  %v1938_v61 = vpop.f32.mrb[54].mxu0  ;;  %v4202_v58 = vld [vmem:[%s5363_s4 + $0x2fc] ss:$88 sps:$4 sm:$0xff]   ;;  %v4207_v48 = vld [vmem:[%s5363_s4 + $0x3b0] ss:$88 sps:$4 sm:$0xff]  }
 0xb33   :  { %v3866_v63 = vpop.f32.mrb[55].mxu0  ;;  %v4205_v61 = vld [vmem:[%s5363_s4 + $0x3ac] ss:$88 sps:$4 sm:$0xff]  }
 0xb34   :  { %v4210_v63 = vld [vmem:[%s5363_s4 + $0x460] ss:$88 sps:$4 sm:$0xff]  }
 0xb38   :  { %v1975_v2 = vpop.f32.mrb[56].mxu0 }
 0xb39   :  { %v3871_v3 = vpop.f32.mrb[57].mxu0  ;;  %v1984_v4 = vsel %vm561_vm3, %v1975_v2, -inf }
 0xb3a   :  { %1985 = vmax.xlane.f32.xlu1 %v1984_v4  ;;  %v1978_v5 = vpop.f32.mrb[58].mxu0  ;;  %v4213_v3 = vld [vmem:[%s5363_s4 + $0x510] ss:$88 sps:$4 sm:$0xff]   ;;  %v4211_v4 = vld [vmem:[%s5363_s4 + $0x50c] ss:$88 sps:$4 sm:$0xff]  }
 0xb3b   :  { %v3872_v6 = vpop.f32.mrb[59].mxu0 }
 0xbbf   :  { %v1983_v11 = vpop.xlane.xlu0 %1982 }
 0xbc0   :  { %v1987_v59 = vsub.f32 %v1935_v56, %v1983_v11  ;;  %v4204_v56 = vld [vmem:[%s5363_s4 + $0x300] ss:$88 sps:$4 sm:$0xff]  }
 0xbc2   :  { %v1989_v57 = vmul.f32 1.442695, %v1987_v59 }
 0xbc4   :  { %4286 = vpow2.f32 %v1989_v57 }
 0xbc7   :  { %v1986_v12 = vpop.xlane.xlu1 %1985 }
 0xbc8   :  { %v1988_v13 = vsub.f32 %v1975_v2, %v1986_v12  ;;  %v4208_v2 = vld [vmem:[%s5363_s4 + $0x45c] ss:$88 sps:$4 sm:$0xff]  }
 0xbca   :  { %v1991_v14 = vmul.f32 1.442695, %v1988_v13 }
 0xbcc   :  { %4288 = vpow2.f32 %v1991_v14 }
 0xbce   :  { %v4287_v15 = vpop.eup %4286 }
 0xbcf   :  { %v1993_v17 = vsel %vm561_vm3, %v4287_v15, 0.0 }
 0xbd0   :  { %1994 = vadd.xlane.f32.xlu0 %v1993_v17 }
 0xbd4   :  { %2184 = vmax.xlane.f32.xlu0 %v2183_v18 }
 0xbd6   :  { %v4289_v19 = vpop.eup %4288 }
 0xbd7   :  { %v1996_v20 = vsel %vm561_vm3, %v4289_v19, 0.0 }
 0xbd8   :  { %1997 = vadd.xlane.f32.xlu1 %v1996_v20 }
 0xc5d   :  { %v1995_v21 = vpop.xlane.xlu0 %1994 }
 0xc5e   :  { %4290 = vrcp.f32 %v1995_v21 }
 0xc61   :  { %v2185_v22 = vpop.xlane.xlu0 %2184 }
 0xc62   :  { %v2189_v23 = vsub.f32 %v2137_v52, %v2185_v22  ;;  %v4198_v52 = vld [vmem:[%s5363_s4 + $0x1a0] ss:$88 sps:$4 sm:$0xff]  }
 0xc64   :  { %v2191_v24 = vmul.f32 1.442695, %v2189_v23 }
 0xc65   :  { %v1998_v25 = vpop.xlane.xlu1 %1997 }
 0xc66   :  { %4292 = vpow2.f32 %v2191_v24 }
 0xc67   :  { %4294 = vrcp.f32 %v1998_v25 }
 0xc68   :  { %v4291_v26 = vpop.eup %4290 }
 0xc69   :  { %v2000_v28 = vmul.f32 %v4291_v26, %v4287_v15 }
 0xc6b   :  { %v3290_v29 = vsel %vm561_vm3, %v2000_v28, 0.0  ;;  %v2003_v30 = vpack.c.bf16 %v2000_v28, %v2000_v28 }
 0xc6c   :  { %3298 = vst [vmem:[%s5368_s9 + $0x10] sm:$0xff] %v3290_v29 }
 0xc6d   :  { %3876 = vmatmul.mubr.msk.bf16.vlgmr.msra.gmra.mrb[60].mxu0 %vm561_vm3, %v2003_v30 }
 0xc6e   :  { %3880 = vmatpush3.bf16.msra.mxu0 %v2055_v31  ;;  %3881 = vmatprep.mubr.msk.bf16.mxu0 %vm4335_vm1, %v4334_v1  ;;  %v4224_v31 = vld [vmem:[%s5363_s4 + $0x4c] ss:$88 sps:$4 sm:$0xff]  }
 0xc6f   :  { %3891 = vmatprep.subr.bf16.mxu0 %v4334_v1 }
 0xc70   :  { %v4293_v32 = vpop.eup %4292 }
 0xc71   :  { %v4295_v33 = vpop.eup %4294  ;;  %v2195_v35 = vsel %vm561_vm3, %v4293_v32, 0.0 }
 0xc72   :  { %v2002_v36 = vmul.f32 %v4295_v33, %v4289_v19  ;;  %2196 = vadd.xlane.f32.xlu0 %v2195_v35  ;;  %v4226_v33 = vld [vmem:[%s5363_s4 + $0xf8] ss:$88 sps:$4 sm:$0xff]   ;;  %v4232_v35 = vld [vmem:[%s5363_s4 + $0x1ac] ss:$88 sps:$4 sm:$0xff]  }
 0xc74   :  { %v3291_v37 = vsel %vm561_vm3, %v2002_v36, 0.0  ;;  %v2004_v38 = vpack.c.bf16 %v2002_v36, %v2002_v36  ;;  %v4230_v36 = vld [vmem:[%s5363_s4 + $0x1a8] ss:$88 sps:$4 sm:$0xff]  }
 0xc75   :  { %3303 = vst [vmem:[%s5368_s9 + $0x38] sm:$0xff] %v3291_v37  ;;  %v4236_v37 = vld [vmem:[%s5363_s4 + $0x25c] ss:$88 sps:$4 sm:$0xff]  }
 0xc76   :  { %3882 = vmatmul.mubr.msk.bf16.vlgmr.msra.gmra.mrb[64].mxu0 %vm561_vm3, %v2004_v38  ;;  %v4234_v38 = vld [vmem:[%s5363_s4 + $0x258] ss:$88 sps:$4 sm:$0xff]  }
 0xc77   :  { %3892 = vmatpush3.bf16.xpose.msra.mxu0 %v2100_v39  ;;  %3893 = vmatprep.mubr.msk.bf16.mxu0 %vm4335_vm1, %v4334_v1  ;;  %v4240_v39 = vld [vmem:[%s5363_s4 + $0x30c] ss:$88 sps:$4 sm:$0xff]  }
 0xc78   :  { %3903 = vmatprep.subr.bf16.mxu0 %v4334_v1 }
 0xc7e   :  { %3894 = vmatmul.mubr.bf16.vlgmr.msra.gmra.mrb[68].mxu0 %v2098_v41  ;;  %v4244_v41 = vld [vmem:[%s5363_s4 + $0x3bc] ss:$88 sps:$4 sm:$0xff]  }
 0xc7f   :  { %3904 = vmatpush3.bf16.msra.mxu0 %v2257_v50  ;;  %3905 = vmatprep.mubr.msk.bf16.mxu0 %vm4335_vm1, %v4334_v1  ;;  %v4242_v50 = vld [vmem:[%s5363_s4 + $0x3b8] ss:$88 sps:$4 sm:$0xff]  }
 0xc80   :  { %3909 = vmatprep.subr.bf16.mxu0 %v4334_v1 }
 0xcff   :  { %v2197_v44 = vpop.xlane.xlu0 %2196 }
 0xd00   :  { %4296 = vrcp.f32 %v2197_v44  ;;  %v4246_v44 = vld [vmem:[%s5363_s4 + $0x468] ss:$88 sps:$4 sm:$0xff]  }
 0xd0a   :  { %v4297_v16 = vpop.eup %4296 }
 0xd0b   :  { %v2202_v45 = vmul.f32 %v4297_v16, %v4293_v32  ;;  %v4228_v32 = vld [vmem:[%s5363_s4 + $0xfc] ss:$88 sps:$4 sm:$0xff]  }
 0xd0d   :  { %v3292_v46 = vsel %vm561_vm3, %v2202_v45, 0.0  ;;  %v2205_v49 = vpack.c.bf16 %v2202_v45, %v2202_v45 }
 0xd0e   :  { %3299 = vst [vmem:[%s5368_s9 + $0x18] sm:$0xff] %v3292_v46  ;;  %v4214_v46 = vld [vmem:[%s5363_s4 + $0x44] ss:$88 sps:$4 sm:$0xff]  }
 0xd0f   :  { %3900 = vmatmul.mubr.msk.bf16.vlgmr.msra.gmra.mrb[32].mxu1 %vm561_vm3, %v2205_v49 }
 0xd10   :  { %2482 = vmatpush1.bf16.msra.mxu1 %v4190_v34  ;;  %2513 = vmatprep.mubr.bf16.mxu1 %v4336_v47 }
 0xd11   :  { %2483 = vmatprep.subr.bf16.mxu1 %v4195_v43 }
 0xd14   :  { %2484 = vmatpush1.bf16.msra.mxu1 %v4193_v51  ;;  %v4215_v51 = vld [vmem:[%s5363_s4 + $0xf4] ss:$88 sps:$4 sm:$0xff]  }
 0xd15   :  { %2485 = vmatprep.subr.bf16.mxu1 %v4198_v52  ;;  %v4216_v52 = vld [vmem:[%s5363_s4 + $0x1a4] ss:$88 sps:$4 sm:$0xff]  }
 0xd18   :  { %2486 = vmatpush1.bf16.msra.mxu1 %v4196_v53  ;;  %v4217_v53 = vld [vmem:[%s5363_s4 + $0x254] ss:$88 sps:$4 sm:$0xff]  }
 0xd19   :  { %2487 = vmatprep.subr.bf16.mxu1 %v4201_v54  ;;  %v4218_v54 = vld [vmem:[%s5363_s4 + $0x304] ss:$88 sps:$4 sm:$0xff]  }
 0xd1c   :  { %2488 = vmatpush1.bf16.msra.mxu1 %v4199_v55  ;;  %v4219_v55 = vld [vmem:[%s5363_s4 + $0x3b4] ss:$88 sps:$4 sm:$0xff]  }
 0xd1d   :  { %2489 = vmatprep.subr.bf16.mxu1 %v4204_v56  ;;  %v4220_v56 = vld [vmem:[%s5363_s4 + $0x464] ss:$88 sps:$4 sm:$0xff]  }
 0xd20   :  { %2490 = vmatpush1.bf16.msra.mxu1 %v4202_v58  ;;  %v4221_v58 = vld [vmem:[%s5363_s4 + $0x514] ss:$88 sps:$4 sm:$0xff]  }
 0xd21   :  { %2491 = vmatprep.subr.bf16.mxu1 %v4207_v48  ;;  %v4225_v48 = vld [vmem:[%s5363_s4 + $0x50] ss:$88 sps:$4 sm:$0xff]  }
 0xd24   :  { %2492 = vmatpush1.bf16.msra.mxu1 %v4205_v61  ;;  %v4229_v61 = vld [vmem:[%s5363_s4 + $0x100] ss:$88 sps:$4 sm:$0xff]  }
 0xd25   :  { %2493 = vmatprep.subr.bf16.mxu1 %v4210_v63  ;;  %v4233_v63 = vld [vmem:[%s5363_s4 + $0x1b0] ss:$88 sps:$4 sm:$0xff]  }
 0xd28   :  { %2494 = vmatpush1.bf16.msra.mxu1 %v4208_v2  ;;  %v4237_v2 = vld [vmem:[%s5363_s4 + $0x260] ss:$88 sps:$4 sm:$0xff]  }
 0xd29   :  { %2495 = vmatprep.subr.bf16.mxu1 %v4213_v3  ;;  %v4241_v3 = vld [vmem:[%s5363_s4 + $0x310] ss:$88 sps:$4 sm:$0xff]  }
 0xd2c   :  { %2496 = vmatpush1.bf16.msra.mxu1 %v4211_v4  ;;  %v4245_v4 = vld [vmem:[%s5363_s4 + $0x3c0] ss:$88 sps:$4 sm:$0xff]  }
 0xd2d   :  { %2743 = vmatprep.subr.bf16.mxu1 %v4224_v31 }
 0xd40   :  { %v2045_v5 = vpop.f32.mrb[60].mxu0 }
 0xd41   :  { %v3877_v6 = vpop.f32.mrb[61].mxu0  ;;  %v2299_v12 = vadd.f32 %v2045_v5, %v4820_v9  ;;  %v4249_v5 = vld [vmem:[%s5363_s4 + $0x470] ss:$88 sps:$4 sm:$0xff]  }
 0xd42   :  { %v2048_v11 = vpop.f32.mrb[62].mxu0  ;;  %v4252_v6 = vld [vmem:[%s5363_s4 + $0x51c] ss:$88 sps:$4 sm:$0xff]  }
 0xd43   :  { %v3878_v59 = vpop.f32.mrb[63].mxu0  ;;  %v4250_v11 = vld [vmem:[%s5363_s4 + $0x518] ss:$88 sps:$4 sm:$0xff]  }
 0xd44   :  { %v4253_v59 = vld [vmem:[%s5363_s4 + $0x520] ss:$88 sps:$4 sm:$0xff]  }
 0xd49   :  { %v2091_v57 = vpop.f32.mrb[64].mxu0 }
 0xd4a   :  { %v2300_v13 = vadd.f32 %v2091_v57, %v4817_v8  ;;  %v3883_v14 = vpop.f32.mrb[65].mxu0 }
 0xd4b   :  { %v2094_v15 = vpop.f32.mrb[66].mxu0 }
 0xd4c   :  { %v5101_v17 = vpack.c.bf16 %v2300_v13, %v2299_v12  ;;  %v3884_v18 = vpop.f32.mrb[67].mxu0 }
 0xd4e   :  { %2514 = vmatmul.mubr.bf16.vlgmr.msra.gmra.mrb[36].mxu1 %v5101_v17 }
 0xd4f   :  { %2775 = vmatprep.mubr.bf16.mxu1 %v4336_v47  ;;  %v4222_v47 = vld [vmem:[%s5363_s4 + $0x48] ss:$88 sps:$4 sm:$0xff]  }
 0xd50   :  { %2744 = vmatpush1.bf16.msra.mxu1 %v4222_v47 }
 0xd51   :  { %v2177_v19 = vpop.f32.mrb[68].mxu0  ;;  %2745 = vmatprep.subr.bf16.mxu1 %v4228_v32 }
 0xd52   :  { %v3895_v20 = vpop.f32.mrb[69].mxu0  ;;  %v2186_v21 = vsel %vm561_vm3, %v2177_v19, -inf }
 0xd53   :  { %2187 = vmax.xlane.f32.xlu1 %v2186_v21  ;;  %v2180_v22 = vpop.f32.mrb[70].mxu0 }
 0xd54   :  { %v3896_v23 = vpop.f32.mrb[71].mxu0  ;;  %2746 = vmatpush1.bf16.msra.mxu1 %v4226_v33 }
 0xd55   :  { %2747 = vmatprep.subr.bf16.mxu1 %v4232_v35 }
 0xd58   :  { %2748 = vmatpush1.bf16.msra.mxu1 %v4230_v36 }
 0xd59   :  { %2749 = vmatprep.subr.bf16.mxu1 %v4236_v37 }
 0xd5c   :  { %2750 = vmatpush1.bf16.msra.mxu1 %v4234_v38 }
 0xd5d   :  { %2751 = vmatprep.subr.bf16.mxu1 %v4240_v39 }
 0xd60   :  { %2752 = vmatpush1.bf16.msra.mxu1 %v4238_v40 }
 0xd61   :  { %2753 = vmatprep.subr.bf16.mxu1 %v4244_v41 }
 0xd64   :  { %2754 = vmatpush1.bf16.msra.mxu1 %v4242_v50 }
 0xd65   :  { %2755 = vmatprep.subr.bf16.mxu1 %v4248_v42 }
 0xd68   :  { %2756 = vmatpush1.bf16.msra.mxu1 %v4246_v44 }
 0xd69   :  { %2757 = vmatprep.subr.bf16.mxu1 %v4252_v6 }
 0xd6c   :  { %2758 = vmatpush1.bf16.msra.mxu1 %v4250_v11 }
 0xd6d   :  { %3949 = vmatprep.subr.bf16.mxu1 %v4334_v1 }
 0xde0   :  { %v2188_v24 = vpop.xlane.xlu1 %2187 }
 0xde1   :  { %v2190_v9 = vsub.f32 %v2177_v19, %v2188_v24  ;;  %v2335_v19 = vld [vmem:[%s5364_s5 + $0xf] sm:$0x7] }
 0xde2   :  { %v5106_v25 = vpop.f32.mrb[32].mxu1  ;;  %v2349_v21 = vrot.slane %v2335_v19, %v4534_v62  ;;  %v2341_v24 = vrot.slane %v2335_v19, %v4537_v0 }
 0xde3   :  { %v2193_v8 = vmul.f32 1.442695, %v2190_v9  ;;  %v3901_v26 = vpop.f32.mrb[33].mxu1  ;;  %v2301_v12 = vadd.f32 %v5106_v25, %v4970_v7  ;;  %v2597_v7 = vld [vmem:[%s5364_s5 + $0x12] sm:$0x7] }
 0xde4   :  { %v2250_v27 = vpop.f32.mrb[34].mxu1  ;;  %v2607_v20 = vrot.slane %v2597_v7, %v4529_v60  ;;  %v2611_v22 = vrot.slane %v2597_v7, %v4534_v62  ;;  %v2603_v9 = vrot.slane %v2597_v7, %v4537_v0  ;;  %v4255_v7 = vld [vmem:[%s5363_s4 + $0x104] ss:$88 sps:$4 sm:$0xff]  }
 0xde5   :  { %4298 = vpow2.f32 %v2193_v8  ;;  %v3902_v28 = vpop.f32.mrb[35].mxu1 }
 0xde6   :  { %v4021_v26 = vadd.f32 %v2611_v22, %v2349_v21  ;;  %v4013_v31 = vadd.f32 %v2603_v9, %v2341_v24  ;;  %v4258_v21 = vld [vmem:[%s5363_s4 + $0x314] ss:$88 sps:$4 sm:$0xff]   ;;  %v4259_v22 = vld [vmem:[%s5363_s4 + $0x3c4] ss:$88 sps:$4 sm:$0xff]  }
 0xde7   :  { %v4261_v24 = vld [vmem:[%s5363_s4 + $0x524] ss:$88 sps:$4 sm:$0xff]  }
 0xde8   :  { %v4262_v9 = vld [vmem:[%s5365_s6] sm:$0xff]  }
 0xdef   :  { %v4299_v29 = vpop.eup %4298 }
 0xdf0   :  { %v2198_v30 = vsel %vm561_vm3, %v4299_v29, 0.0 }
 0xdf1   :  { %2199 = vadd.xlane.f32.xlu1 %v2198_v30 }
 0xe7e   :  { %v2200_v16 = vpop.xlane.xlu1 %2199 }
 0xe7f   :  { %4300 = vrcp.f32 %v2200_v16 }
 0xe89   :  { %v4301_v45 = vpop.eup %4300 }
 0xe8a   :  { %v2204_v34 = vmul.f32 %v4301_v45, %v4299_v29 }
 0xe8c   :  { %v3293_v49 = vsel %vm561_vm3, %v2204_v34, 0.0  ;;  %v2206_v43 = vpack.c.bf16 %v2204_v34, %v2204_v34 }
 0xe8d   :  { %3304 = vst [vmem:[%s5368_s9 + $0x40] sm:$0xff] %v3293_v49 }
 0xe8e   :  { %3906 = vmatmul.mubr.msk.bf16.vlgmr.msra.gmra.mrb[72].mxu0 %vm561_vm3, %v2206_v43 }
 0xe8f   :  { %3910 = vmatpush3.bf16.msra.mxu0 %v4214_v46  ;;  %3925 = vmatprep.mubr.msk.bf16.mxu0 %vm4335_vm1, %v4334_v1 }
 0xe90   :  { %3911 = vmatprep.subr.bf16.mxu0 %v4334_v1 }
 0xe93   :  { %3912 = vmatpush3.bf16.msra.mxu0 %v4215_v51 }
 0xe94   :  { %3913 = vmatprep.subr.bf16.mxu0 %v4334_v1 }
 0xe97   :  { %3914 = vmatpush3.bf16.msra.mxu0 %v4216_v52 }
 0xe98   :  { %3915 = vmatprep.subr.bf16.mxu0 %v4334_v1 }
 0xe9b   :  { %3916 = vmatpush3.bf16.msra.mxu0 %v4217_v53 }
 0xe9c   :  { %3917 = vmatprep.subr.bf16.mxu0 %v4334_v1 }
 0xe9f   :  { %3918 = vmatpush3.bf16.msra.mxu0 %v4218_v54 }
 0xea0   :  { %3919 = vmatprep.subr.bf16.mxu0 %v4334_v1 }
 0xea3   :  { %3920 = vmatpush3.bf16.msra.mxu0 %v4219_v55 }
 0xea4   :  { %3921 = vmatprep.subr.bf16.mxu0 %v4334_v1 }
 0xea7   :  { %3922 = vmatpush3.bf16.msra.mxu0 %v4220_v56 }
 0xea8   :  { %3923 = vmatprep.subr.bf16.mxu0 %v4334_v1 }
 0xeab   :  { %3924 = vmatpush3.bf16.msra.mxu0 %v4221_v58 }
 0xeac   :  { %3929 = vmatprep.subr.bf16.mxu0 %v4334_v1 }
 0xeae   :  { %3926 = vmatmul.mubr.bf16.vlgmr.msra.gmra.mrb[76].mxu0 %v5101_v17 }
 0xeaf   :  { %3930 = vmatpush3.bf16.msra.mxu0 %v4225_v48  ;;  %3945 = vmatprep.mubr.msk.bf16.mxu0 %vm4335_vm1, %v4334_v1 }
 0xeb0   :  { %3931 = vmatprep.subr.bf16.mxu0 %v4334_v1 }
 0xeb3   :  { %3932 = vmatpush3.bf16.msra.mxu0 %v4229_v61 }
 0xeb4   :  { %3933 = vmatprep.subr.bf16.mxu0 %v4334_v1 }
 0xeb7   :  { %3934 = vmatpush3.bf16.msra.mxu0 %v4233_v63 }
 0xeb8   :  { %3935 = vmatprep.subr.bf16.mxu0 %v4334_v1 }
 0xebb   :  { %3936 = vmatpush3.bf16.msra.mxu0 %v4237_v2 }
 0xebc   :  { %3937 = vmatprep.subr.bf16.mxu0 %v4334_v1 }
 0xebf   :  { %3938 = vmatpush3.bf16.msra.mxu0 %v4241_v3 }
 0xec0   :  { %3939 = vmatprep.subr.bf16.mxu0 %v4334_v1 }
 0xec3   :  { %3940 = vmatpush3.bf16.msra.mxu0 %v4245_v4 }
 0xec4   :  { %3941 = vmatprep.subr.bf16.mxu0 %v4334_v1 }
 0xec7   :  { %3942 = vmatpush3.bf16.msra.mxu0 %v4249_v5 }
 0xec8   :  { %3943 = vmatprep.subr.bf16.mxu0 %v4334_v1 }
 0xecb   :  { %3944 = vmatpush3.bf16.msra.mxu0 %v4253_v59 }
 0xecc   :  { %3955 = vmatprep.subr.bf16.mxu0 %v4334_v1 }
 0xf61   :  { %v2293_v57 = vpop.f32.mrb[72].mxu0 }
 0xf62   :  { %v2302_v13 = vadd.f32 %v2293_v57, %v4972_v10  ;;  %v3907_v14 = vpop.f32.mrb[73].mxu0  ;;  %v2345_v10 = vrot.slane %v2335_v19, %v4529_v60 }
 0xf63   :  { %v2296_v15 = vpop.f32.mrb[74].mxu0 }
 0xf64   :  { %v2598_v17 = vpack.c.bf16 %v2302_v13, %v2301_v12  ;;  %v3908_v18 = vpop.f32.mrb[75].mxu0  ;;  %v4015_v23 = vadd.f32 %v2607_v20, %v2345_v10  ;;  %v4254_v13 = vld [vmem:[%s5363_s4 + $0x54] ss:$88 sps:$4 sm:$0xff]   ;;  %v4257_v20 = vld [vmem:[%s5363_s4 + $0x264] ss:$88 sps:$4 sm:$0xff]  }
 0xf65   :  { %v4256_v10 = vld [vmem:[%s5363_s4 + $0x1b4] ss:$88 sps:$4 sm:$0xff]  }
 0xf66   :  { %2776 = vmatmul.mubr.bf16.vlgmr.msra.gmra.mrb[36].mxu1 %v2598_v17  ;;  %3946 = vmatmul.mubr.bf16.vlgmr.msra.gmra.mrb[76].mxu0 %v2598_v17 }
 0xf67   :  { %3951 = vmatprep.mubr.msk.bf16.mxu1 %vm4335_vm1, %v4334_v1  ;;  %3957 = vmatprep.mubr.msk.bf16.mxu0 %vm4335_vm1, %v4334_v1 }
0x1039   :  { %v2777_v25 = vpop.f32.mrb[36].mxu1  ;;  %v2820_v8 = vpop.f32.mrb[76].mxu0 }
0x103a   :  { %v2779_v27 = vpop.f32.mrb[37].mxu1  ;;  %v3947_v28 = vpop.f32.mrb[77].mxu0  ;;  %v4022_v36 = vadd.f32 %v4021_v26, %v2820_v8  ;;  %v4014_v37 = vadd.f32 %v4013_v31, %v2777_v25  ;;  %v4263_v25 = vld [vmem:[%s5365_s6 + $0x8] sm:$0xff]   ;;  %v4264_v8 = vld [vmem:[%s5365_s6 + $0x10] sm:$0xff]  }
0x103b   :  { %v4016_v29 = vadd.f32 %v4015_v23, %v2779_v27  ;;  %v2781_v30 = vpop.f32.mrb[38].mxu1  ;;  %v2823_v47 = vpop.f32.mrb[78].mxu0  ;;  %v4266_v27 = vld [vmem:[%s5365_s6 + $0x20] sm:$0xff]   ;;  %v4267_v28 = vld [vmem:[%s5365_s6 + $0x28] sm:$0xff]  }
0x103c   :  { %v2783_v32 = vpop.f32.mrb[39].mxu1  ;;  %v3948_v60 = vpop.f32.mrb[79].mxu0  ;;  %v4024_v38 = vadd.f32 %v4021_v26, %v2823_v47  ;;  %v2837_v0 = vpack.c.bf16 %v4022_v36, %v4022_v36  ;;  %v4018_v39 = vadd.f32 %v4013_v31, %v2781_v30  ;;  %v2833_v40 = vpack.c.bf16 %v4014_v37, %v4014_v37  ;;  %v4265_v26 = vld [vmem:[%s5365_s6 + $0x18] sm:$0xff]  }
0x103d   :  { %v2835_v33 = vpack.c.bf16 %v4016_v29, %v4016_v29  ;;  %v4020_v35 = vadd.f32 %v4015_v23, %v2783_v32  ;;  %v4260_v23 = vld [vmem:[%s5363_s4 + $0x474] ss:$88 sps:$4 sm:$0xff]  }
0x103e   :  { %v2838_v41 = vpack.c.bf16 %v4024_v38, %v4024_v38  ;;  %v2947_v50 = vsel %vm589_vm2, %v2837_v0, 0  ;;  %v2834_v42 = vpack.c.bf16 %v4018_v39, %v4018_v39 }
0x103f   :  { %v2836_v62 = vpack.c.bf16 %v4020_v35, %v4020_v35  ;;  %3950 = vmatpush3.bf16.xpose.msra.mxu1 %v2835_v33 }
0x1040   :  { %3961 = vmatprep.subr.bf16.mxu1 %v4334_v1  ;;  %v2993_v44 = vsel %vm589_vm2, %v2838_v41, 0 }
0x1041   :  { %3956 = vmatpush3.bf16.xpose.msra.mxu0 %v2836_v62 }
0x1042   :  { %3967 = vmatprep.subr.bf16.mxu0 %v4334_v1 }
0x1046   :  { %3952 = vmatmul.mubr.bf16.vlgmr.msra.gmra.mrb[40].mxu1 %v2833_v40 }
0x1047   :  { %3962 = vmatpush3.bf16.msra.mxu1 %v2947_v50  ;;  %3963 = vmatprep.mubr.msk.bf16.mxu1 %vm4335_vm1, %v4334_v1 }
0x1048   :  { %3958 = vmatmul.mubr.bf16.vlgmr.msra.gmra.mrb[80].mxu0 %v2834_v42  ;;  %3973 = vmatprep.subr.bf16.mxu1 %v4334_v1 }
0x1049   :  { %3968 = vmatpush3.bf16.msra.mxu0 %v2993_v44  ;;  %3969 = vmatprep.mubr.msk.bf16.mxu0 %vm4335_vm1, %v4334_v1 }
0x104a   :  { %3993 = vmatprep.subr.bf16.mxu0 %v4334_v1 }
0x1119   :  { %v2873_v16 = vpop.f32.mrb[40].mxu1 }
0x111a   :  { %v3953_v45 = vpop.f32.mrb[41].mxu1  ;;  %v2919_v34 = vsel %vm561_vm3, %v2873_v16, -inf }
0x111b   :  { %2920 = vmax.xlane.f32.xlu0 %v2919_v34  ;;  %v2876_v46 = vpop.f32.mrb[42].mxu1  ;;  %v2913_v49 = vpop.f32.mrb[80].mxu0 }
0x111c   :  { %v3954_v43 = vpop.f32.mrb[43].mxu1  ;;  %v3959_v51 = vpop.f32.mrb[81].mxu0  ;;  %v2922_v52 = vsel %vm561_vm3, %v2913_v49, -inf }
0x111d   :  { %2923 = vmax.xlane.f32.xlu1 %v2922_v52  ;;  %v2916_v53 = vpop.f32.mrb[82].mxu0 }
0x111e   :  { %v3960_v54 = vpop.f32.mrb[83].mxu0 }
0x111f   :  { %v4268_v54 = vld [vmem:[%s5365_s6 + $0x30] sm:$0xff]  }
0x11a8   :  { %v2921_v55 = vpop.xlane.xlu0 %2920 }
0x11a9   :  { %v2925_v56 = vsub.f32 %v2873_v16, %v2921_v55  ;;  %v4269_v55 = vld [vmem:[%s5365_s6 + $0x38] sm:$0xff]  }
0x11aa   :  { %v2924_v58 = vpop.xlane.xlu1 %2923 }
0x11ab   :  { %v2927_v48 = vmul.f32 1.442695, %v2925_v56  ;;  %v2926_v61 = vsub.f32 %v2913_v49, %v2924_v58  ;;  %v3508_v56 = vld [vmem:[%s5364_s5 + $0x15] ss:$0 sm:$0xff]  ;;  %s4310_s5 = scalar_lea.vmem %s3313_s11, 32 }
0x11ac   :  { %p4311_p0 = scmp.ne.s32.totalorder %s3313_s11, %s4310_s5  ;;  %p4316_p2 = scmp.lt.s32.totalorder %s4310_s5, %s4310_s5 }
0x11ad   :  { %4302 = vpow2.f32 %v2927_v48  ;;  %v2929_v63 = vmul.f32 1.442695, %v2926_v61 }
0x11ae   :  { %p4317_p3 = por %p4316_p2, %p4315_p1 }
0x11af   :  { %4304 = vpow2.f32 %v2929_v63 }
0x11b0   :  { %p4318_p4 = pnand %p4317_p3, %p4311_p0 }
0x11b7   :  { %v4303_v2 = vpop.eup %4302 }
0x11b8   :  { %v2931_v3 = vsel %vm561_vm3, %v4303_v2, 0.0 }
0x11b9   :  { %v4305_v4 = vpop.eup %4304  ;;  %2932 = vadd.xlane.f32.xlu0 %v2931_v3 }
0x11ba   :  { %v2934_v5 = vsel %vm561_vm3, %v4305_v4, 0.0 }
0x11bb   :  { %2935 = vadd.xlane.f32.xlu1 %v2934_v5 }
0x1246   :  { %v2933_v6 = vpop.xlane.xlu0 %2932 }
0x1247   :  { %4306 = vrcp.f32 %v2933_v6 }
0x1248   :  { %v2936_v11 = vpop.xlane.xlu1 %2935 }
0x1249   :  { %4308 = vrcp.f32 %v2936_v11 }
0x1251   :  { %v4307_v59 = vpop.eup %4306 }
0x1252   :  { %v2938_v57 = vmul.f32 %v4307_v59, %v4303_v2 }
0x1253   :  { %v4309_v12 = vpop.eup %4308 }
0x1254   :  { %v3294_v14 = vsel %vm561_vm3, %v2938_v57, 0.0  ;;  %v2940_v15 = vmul.f32 %v4309_v12, %v4305_v4  ;;  %v2941_v17 = vpack.c.bf16 %v2938_v57, %v2938_v57 }
0x1255   :  { %3300 = vst [vmem:[%s5368_s9 + $0x20] sm:$0xff] %v3294_v14 }
0x1256   :  { %v3295_v18 = vsel %vm561_vm3, %v2940_v15, 0.0  ;;  %3964 = vmatmul.mubr.msk.bf16.vlgmr.msra.gmra.mrb[44].mxu1 %vm561_vm3, %v2941_v17  ;;  %v2942_v19 = vpack.c.bf16 %v2940_v15, %v2940_v15 }
0x1257   :  { %3305 = vst [vmem:[%s5368_s9 + $0x48] sm:$0xff] %v3295_v18  ;;  %3974 = vmatpush3.bf16.msra.mxu1 %v4254_v13  ;;  %3989 = vmatprep.mubr.msk.bf16.mxu1 %vm4335_vm1, %v4334_v1 }
0x1258   :  { %3970 = vmatmul.mubr.msk.bf16.vlgmr.msra.gmra.mrb[84].mxu0 %vm561_vm3, %v2942_v19  ;;  %3975 = vmatprep.subr.bf16.mxu1 %v4334_v1 }
0x1259   :  { %4009 = vmatprep.mubr.msk.bf16.mxu0 %vm4335_vm1, %v4334_v1  ;;  %3994 = vmatpush3.bf16.msra.mxu0 %v4262_v9 }
0x125a   :  { %3995 = vmatprep.subr.bf16.mxu0 %v4334_v1 }
0x125b   :  { %3976 = vmatpush3.bf16.msra.mxu1 %v4255_v7 }
0x125c   :  { %3977 = vmatprep.subr.bf16.mxu1 %v4334_v1 }
0x125d   :  { %3996 = vmatpush3.bf16.msra.mxu0 %v4263_v25 }
0x125e   :  { %3997 = vmatprep.subr.bf16.mxu0 %v4334_v1 }
0x125f   :  { %3978 = vmatpush3.bf16.msra.mxu1 %v4256_v10 }
0x1260   :  { %3979 = vmatprep.subr.bf16.mxu1 %v4334_v1 }
0x1261   :  { %3998 = vmatpush3.bf16.msra.mxu0 %v4264_v8 }
0x1262   :  { %3999 = vmatprep.subr.bf16.mxu0 %v4334_v1 }
0x1263   :  { %3980 = vmatpush3.bf16.msra.mxu1 %v4257_v20 }
0x1264   :  { %3981 = vmatprep.subr.bf16.mxu1 %v4334_v1 }
0x1265   :  { %4000 = vmatpush3.bf16.msra.mxu0 %v4265_v26 }
0x1266   :  { %4001 = vmatprep.subr.bf16.mxu0 %v4334_v1 }
0x1267   :  { %3982 = vmatpush3.bf16.msra.mxu1 %v4258_v21 }
0x1268   :  { %3983 = vmatprep.subr.bf16.mxu1 %v4334_v1 }
0x1269   :  { %4002 = vmatpush3.bf16.msra.mxu0 %v4266_v27 }
0x126a   :  { %4003 = vmatprep.subr.bf16.mxu0 %v4334_v1 }
0x126b   :  { %3984 = vmatpush3.bf16.msra.mxu1 %v4259_v22 }
0x126c   :  { %3985 = vmatprep.subr.bf16.mxu1 %v4334_v1 }
0x126d   :  { %4004 = vmatpush3.bf16.msra.mxu0 %v4267_v28 }
0x126e   :  { %4005 = vmatprep.subr.bf16.mxu0 %v4334_v1 }
0x126f   :  { %3986 = vmatpush3.bf16.msra.mxu1 %v4260_v23 }
0x1270   :  { %3987 = vmatprep.subr.bf16.mxu1 %v4334_v1 }
0x1271   :  { %4006 = vmatpush3.bf16.msra.mxu0 %v4268_v54 }
0x1272   :  { %4007 = vmatprep.subr.bf16.mxu0 %v4334_v1  ;;  %v3517_v1 = vld [vmem:[%s5366_s7] ss:$0 sm:$0xff] }
0x1273   :  { %3988 = vmatpush3.bf16.msra.mxu1 %v4261_v24 }
0x1275   :  { %4008 = vmatpush3.bf16.msra.mxu0 %v4269_v55 }
0x1329   :  { %v2983_v29 = vpop.f32.mrb[44].mxu1 }
0x132a   :  { %v3035_v30 = vrot.slane %v2983_v29, 4  ;;  %v3965_v47 = vpop.f32.mrb[45].mxu1 }
0x132b   :  { %v2986_v31 = vpop.f32.mrb[46].mxu1  ;;  %v3029_v32 = vpop.f32.mrb[84].mxu0 }
0x132c   :  { %v3036_v60 = vadd.f32 %v3035_v30, %v2983_v29  ;;  %v3041_v33 = vrot.slane %v3029_v32, 4  ;;  %v3966_v35 = vpop.f32.mrb[47].mxu1  ;;  %v3971_v36 = vpop.f32.mrb[85].mxu0 }
0x132d   :  { %v3032_v62 = vpop.f32.mrb[86].mxu0 }
0x132e   :  { %v3037_v37 = vrot.slane %v3036_v60, 2  ;;  %v3042_v38 = vadd.f32 %v3041_v33, %v3029_v32  ;;  %v3972_v0 = vpop.f32.mrb[87].mxu0 }
0x1330   :  { %v3038_v39 = vadd.f32 %v3037_v37, %v3036_v60  ;;  %v3043_v40 = vrot.slane %v3042_v38, 2 }
0x1332   :  { %v3039_v41 = vrot.slane %v3038_v39, 1  ;;  %v3044_v50 = vadd.f32 %v3043_v40, %v3042_v38 }
0x1334   :  { %v3040_v42 = vadd.f32 %v3039_v41, %v3038_v39  ;;  %v3045_v44 = vrot.slane %v3044_v50, 1 }
0x1336   :  { %v3048_v16 = vmul.f32 0.125, %v3040_v42  ;;  %v3046_v45 = vadd.f32 %v3045_v44, %v3044_v50 }
0x1338   :  { %v3067_v34 = vpack.c.bf16 %v3048_v16, %v3048_v16  ;;  %v3049_v46 = vmul.f32 0.125, %v3046_v45 }
0x133a   :  { %v3068_v49 = vpack.c.bf16 %v3049_v46, %v3049_v46  ;;  %v3077_v43 = vunpack.c.l.b16 %v3067_v34 }
0x133c   :  { %v3078_v51 = vunpack.c.l.b16 %v3068_v49 }
0x133e   :  { %v3080_v52 = vsel %vm3079_vm4, %v3078_v51, %v3077_v43 }
0x133f   :  { %v3081_v53 = vpack.c.b16 %v3080_v52, %v3080_v52 }
0x1341   :  { %3990 = vmatmul.mubr.bf16.vlgmr.msra.gmra.mrb[48].mxu1 %v3081_v53 }
0x1414   :  { %v3165_v58 = vpop.f32.mrb[48].mxu1 }
0x1415   :  { %v3166_v48 = vadd.f32 %v3508_v56, %v3165_v58  ;;  %v3991_v61 = vpop.f32.mrb[49].mxu1 }
0x1416   :  { %v3168_v63 = vpop.f32.mrb[50].mxu1 }
0x1417   :  { %v3171_v2 = vmax.f32 %v3166_v48, 0.0  ;;  %v3992_v3 = vpop.f32.mrb[51].mxu1 }
0x1419   :  { %v3189_v4 = vpack.c.bf16 %v3171_v2, %v3171_v2 }
0x141b   :  { %4010 = vmatmul.mubr.bf16.vlgmr.msra.gmra.mrb[88].mxu0 %v3189_v4 }
0x14ee   :  { %v3278_v5 = vpop.f32.mrb[88].mxu0 }
0x14ef   :  { %v3279_v6 = vadd.f32 %v3517_v1, %v3278_v5  ;;  %v4011_v11 = vpop.f32.mrb[89].mxu0 }
0x14f0   :  { %v3281_v59 = vpop.f32.mrb[90].mxu0 }
0x14f1   :  { %v4012_v57 = vpop.f32.mrb[91].mxu0  ;;  %3285 = vst.msk [vmem:[#allocation2] sm:$0x3] %vm3284_vm5, %v3279_v6 }
0x14f2   :  { %4321 = shalt.err (!%p4318_p4)
}
0x14f3   :  { %s4322_s7 = scalar_lea.hbm %s5367_s8, 32 }
0x14f4   :  { %p4323_p5 = scmp.ne.s32.totalorder %s5367_s8, %s4322_s7  ;;  %p4326_p6 = scmp.lt.u32.totalorder %s4322_s7, %s5367_s8 }
0x14f6   :  { %p4328_p7 = pnand %p4326_p6, %p4323_p5 }
0x14f8   :  { %4331 = shalt.err (!%p4328_p7)
}
0x14f9   :  { %3315 = dma.vmem_to_hbm [thread:$0]  %s3313_s11, 32, %s5367_s8, [#allocation3]  }
0x14fa   :  { %4332 = dma.done.wait [#allocation3], 32  }
0x14fb   :  { %4333 = vsyncadd [#allocation3], 4294967264 }
0x14fc   :  { %3323 = vsyncpa [#allocation3], 1 }

</bundles_post_ra>
